<compile_context>
chip_gen: v6e
topology: v6e:2x2x1
jax: 0.10.0
libtpu: 0.0.40
codegen_flags: <defaults>
</compile_context>

<pallas_src>
import math
from functools import partial

import jax
import jax.numpy as jnp
from jax.experimental import pallas as pl
from jax.experimental.pallas import tpu as pltpu


def _fusion_kernel(x_ref, img_ref, wq_ref, wkv_ref, wo_ref, vec_ref,
                   o_ref, xacc_ref, *, num_heads, ln_eps, compute_dtype):
    """One (batch-block, layer) grid step.

    NOTE: the layer grid axis is innermost and MUST stay "arbitrary" -- the
    running activation is carried across layers in the VMEM scratch xacc_ref.
    """
    layer = pl.program_id(1)
    n_layers = pl.num_programs(1)
    H = num_heads
    cd = compute_dtype

    # Initialize the resident running activation from text_embeds at layer 0.
    @pl.when(layer == 0)
    def _():
        xacc_ref[...] = x_ref[...].astype(jnp.float32)

    x3 = xacc_ref[...]                               # (Bt, Lq, E) f32 running activations
    Bt, Lq, E = x3.shape
    Dh = E // H
    img3 = img_ref[...]                              # (Bt, Lk, E), resident across layers
    Lk = img3.shape[1]

    wq = wq_ref[0].astype(cd)                        # (E, E)   Wq.T * 1/sqrt(Dh)
    wkv = wkv_ref[0].astype(cd)                      # (E, 2E)  [Wk.T | Wv.T]
    wo = wo_ref[0].astype(cd)                        # (E, E)   Wo.T
    vec = vec_ref[0].astype(jnp.float32)             # (6, E)   [bq*s, bk, bv, bo, gamma, beta]

    # ---- Merged, lane-dense projections (single full-width MXU matmuls) ----
    x2 = x3.reshape(Bt * Lq, E).astype(cd)           # major-dim flatten: fills MXU rows
    img2 = img3.reshape(Bt * Lk, E).astype(cd)

    q2 = jnp.dot(x2, wq, preferred_element_type=jnp.float32) + vec[0:1]     # (Bt*Lq, E)
    kv2 = jnp.dot(img2, wkv, preferred_element_type=jnp.float32)            # (Bt*Lk, 2E)
    k2 = kv2[:, :E] + vec[1:2]
    v2 = kv2[:, E:] + vec[2:3]

    # ---- Head split: static lane slices + major-axis stack (no big relayout) ----
    def split_heads(t2, L):                          # (Bt*L, E) -> (Bt*H, L, Dh)
        t3 = t2.reshape(Bt, L, E)
        h4 = jnp.stack([t3[:, :, h * Dh:(h + 1) * Dh] for h in range(H)], axis=1)
        return h4.reshape(Bt * H, L, Dh)

    qh = split_heads(q2, Lq).astype(cd)
    kh = split_heads(k2, Lk).astype(cd)
    vh = split_heads(v2, Lk).astype(cd)

    # ---- Attention, batched over (batch, head); 1/sqrt(Dh) already in Wq/bq ----
    s = jnp.einsum('gqd,gkd->gqk', qh, kh, preferred_element_type=jnp.float32)
    s = s - jnp.max(s, axis=-1, keepdims=True)
    p = jnp.exp(s)
    # Exact divide to hold the 1e-4 f32 check; pl.reciprocal(approx=True) is a
    # cheap EUP-slot alternative when running in bf16.
    p = p / jnp.sum(p, axis=-1, keepdims=True)
    ctx = jnp.einsum('gqk,gkd->gqd', p.astype(cd), vh,
                     preferred_element_type=jnp.float32)                     # (Bt*H, Lq, Dh)

    # ---- Merge heads to lane-dense (Bt*Lq, E), ONE out-proj matmul (K = E) ----
    ctx4 = ctx.reshape(Bt, H, Lq, Dh)
    ctx_m = jnp.concatenate([ctx4[:, h] for h in range(H)], axis=-1)         # (Bt, Lq, E)
    ctx2 = ctx_m.reshape(Bt * Lq, E).astype(cd)

    y2 = jnp.dot(ctx2, wo, preferred_element_type=jnp.float32) + vec[3:4]
    y3 = y2.reshape(Bt, Lq, E) + x3                                          # residual

    # ---- LayerNorm over the hidden dim (biased variance, eps like PyTorch) ----
    mean = jnp.mean(y3, axis=-1, keepdims=True)
    var = jnp.mean(jnp.square(y3 - mean), axis=-1, keepdims=True)
    out = (y3 - mean) * jax.lax.rsqrt(var + ln_eps) * vec[4:5] + vec[5:6]

    xacc_ref[...] = out                              # carried to the next layer in VMEM

    @pl.when(layer == n_layers - 1)
    def _():
        o_ref[...] = out.astype(o_ref.dtype)


def _prepare_params(params, num_heads):
    """Host-side packing: pre-transpose, merge K|V, fold the softmax scale into Wq/bq."""
    L = len(params)
    wq, wk, wv, bq, bk, bv, wo, bo, gamma, beta = [jnp.stack(t) for t in zip(*params)]
    E = wq.shape[-1]
    Dh = E // num_heads
    scale = 1.0 / math.sqrt(Dh)

    wq_t = jnp.transpose(wq, (0, 2, 1)) * scale                              # (L, E, E)
    wkv_t = jnp.concatenate([jnp.transpose(wk, (0, 2, 1)),
                             jnp.transpose(wv, (0, 2, 1))], axis=-1)         # (L, E, 2E)
    wo_t = jnp.transpose(wo, (0, 2, 1))                                      # (L, E, E)
    vec = jnp.stack([bq * scale, bk, bv, bo, gamma, beta], axis=1)           # (L, 6, E)
    return wq_t, wkv_t, wo_t, vec


def _pick_batch_block(B, max_bt=8):
    """Largest divisor of B (<= max_bt) that keeps >= 2 batch grid steps when B >= 2."""
    bt = 1
    for cand in range(1, min(B, max_bt) + 1):
        if B % cand == 0 and (B // cand >= 2 or B == 1):
            bt = cand
    return bt


def multi_layer_cross_attention_fusion(text_embeds, image_embeds, params, num_heads,
                                       compute_dtype=jnp.float32, batch_block=None):
    B, Lq, E = text_embeds.shape
    _, Lk, _ = image_embeds.shape
    L = len(params)
    assert E % num_heads == 0

    wq_t, wkv_t, wo_t, vec = _prepare_params(params, num_heads)
    # Matmul operands in compute_dtype (use jnp.bfloat16 on v6e/v7x to halve
    # weight DMA and feed the bf16 MXU; accumulation stays f32 either way).
    wq_t = wq_t.astype(compute_dtype)
    wkv_t = wkv_t.astype(compute_dtype)
    wo_t = wo_t.astype(compute_dtype)

    bt = _pick_batch_block(B) if batch_block is None else batch_block
    assert B % bt == 0

    kernel = partial(_fusion_kernel, num_heads=num_heads, ln_eps=1e-5,
                     compute_dtype=compute_dtype)

    # Explicit VMEM budget (double-buffered weight + activation blocks + scratch),
    # clamped to the v7x-safe 64 MiB physical ceiling.
    w_itemsize = jnp.dtype(compute_dtype).itemsize
    a_itemsize = jnp.dtype(text_embeds.dtype).itemsize
    weight_block = (4 * E * E) * w_itemsize + 6 * E * 4
    act_block = (2 * bt * Lq * E + bt * Lk * E) * a_itemsize
    scratch_bytes = bt * Lq * E * 4
    vmem_need = 2 * (weight_block + act_block) + scratch_bytes + (4 << 20)
    vmem_limit = int(min(max(vmem_need, 32 << 20), 64 << 20))
    # TODO(synk): for E >= ~1536 f32 (>= ~2048 bf16) add a weight-tiling grid axis
    #             instead of loading whole per-layer weights (v7x 64 MiB VMEM).

    return pl.pallas_call(
        kernel,
        out_shape=jax.ShapeDtypeStruct((B, Lq, E), text_embeds.dtype),
        grid=(B // bt, L),  # batch (parallel, megacore-shardable) x layers (arbitrary)
        in_specs=[
            pl.BlockSpec((bt, Lq, E), lambda b, l: (b, 0, 0)),        # text embeds
            pl.BlockSpec((bt, Lk, E), lambda b, l: (b, 0, 0)),        # image embeds
            pl.BlockSpec((1, E, E), lambda b, l: (l, 0, 0)),          # Wq.T (scaled)
            pl.BlockSpec((1, E, 2 * E), lambda b, l: (l, 0, 0)),      # [Wk.T | Wv.T]
            pl.BlockSpec((1, E, E), lambda b, l: (l, 0, 0)),          # Wo.T
            pl.BlockSpec((1, 6, E), lambda b, l: (l, 0, 0)),          # bq*s,bk,bv,bo,gamma,beta
        ],
        out_specs=pl.BlockSpec((bt, Lq, E), lambda b, l: (b, 0, 0)),
        scratch_shapes=[pltpu.VMEM((bt, Lq, E), jnp.float32)],        # running x (layer carry)
        compiler_params=pltpu.CompilerParams(
            dimension_semantics=("parallel", "arbitrary"),
            vmem_limit_bytes=vmem_limit),
    )(text_embeds, image_embeds, wq_t, wkv_t, wo_t, vec)


def init_params(key, hidden_dim, num_layers=2):
    """Deterministic synthetic parameters with the same shapes as the PyTorch module."""
    params = []
    bound = 1.0 / math.sqrt(hidden_dim)
    for _ in range(num_layers):
        key, k0, k1, k2, k3, k4, k5 = jax.random.split(key, 7)
        in_proj_w = jax.random.uniform(k0, (3 * hidden_dim, hidden_dim),
                                       jnp.float32, -bound, bound)
        in_proj_b = jax.random.uniform(k1, (3 * hidden_dim,),
                                       jnp.float32, -bound, bound)
        out_w = jax.random.uniform(k2, (hidden_dim, hidden_dim),
                                   jnp.float32, -bound, bound)
        out_b = jax.random.uniform(k3, (hidden_dim,), jnp.float32, -bound, bound)
        gamma = 1.0 + 0.1 * jax.random.normal(k4, (hidden_dim,), jnp.float32)
        beta = 0.1 * jax.random.normal(k5, (hidden_dim,), jnp.float32)
        wq, wk, wv = jnp.split(in_proj_w, 3, axis=0)
        bq, bk, bv = jnp.split(in_proj_b, 3)
        params.append((wq, wk, wv, bq, bk, bv, out_w, out_b, gamma, beta))
    return params


def _reference_layer(x, img, p, num_heads):
    """Pure-JAX reference matching nn.MultiheadAttention + residual + LayerNorm."""
    wq, wk, wv, bq, bk, bv, wo, bo, gamma, beta = p
    B, Lq, E = x.shape
    Lk = img.shape[1]
    Dh = E // num_heads
    q = x @ wq.T + bq
    k = img @ wk.T + bk
    v = img @ wv.T + bv
    qh = q.reshape(B, Lq, num_heads, Dh).transpose(0, 2, 1, 3) / math.sqrt(Dh)
    kh = k.reshape(B, Lk, num_heads, Dh).transpose(0, 2, 1, 3)
    vh = v.reshape(B, Lk, num_heads, Dh).transpose(0, 2, 1, 3)
    s = jnp.einsum('bhqd,bhkd->bhqk', qh, kh)
    pw = jax.nn.softmax(s, axis=-1)
    o = jnp.einsum('bhqk,bhkd->bhqd', pw, vh)
    o = o.transpose(0, 2, 1, 3).reshape(B, Lq, E)
    y = o @ wo.T + bo + x
    mean = y.mean(-1, keepdims=True)
    var = ((y - mean) ** 2).mean(-1, keepdims=True)
    return ((y - mean) * jax.lax.rsqrt(var + 1e-5)) * gamma + beta


if __name__ == "__main__":
    B, Lq, Lk, E, H, num_layers = 2, 8, 16, 32, 8, 2
    key = jax.random.PRNGKey(0)
    k_text, k_img, k_params = jax.random.split(key, 3)
    text_embeds = jax.random.normal(k_text, (B, Lq, E), jnp.float32)
    image_embeds = jax.random.normal(k_img, (B, Lk, E), jnp.float32)
    params = init_params(k_params, E, num_layers=num_layers)

    out = multi_layer_cross_attention_fusion(text_embeds, image_embeds, params, H)
    out = jax.block_until_ready(out)

    ref = text_embeds
    for p in params:
        ref = _reference_layer(ref, image_embeds, p, H)
    assert out.shape == (B, Lq, E)
    err = float(jnp.max(jnp.abs(out - ref)))
    assert jnp.allclose(out, ref, atol=1e-4, rtol=1e-4), err
    print("KERNEL_OK")
</pallas_src>

<mosaic_0001>
module attributes {stable_mosaic.version = 11 : i64} {
  func.func @_fusion_kernel(%arg0: i32, %arg1: i32, %arg2: memref<1x8x32xf32, #tpu.memory_space<vmem>>, %arg3: memref<1x16x32xf32, #tpu.memory_space<vmem>>, %arg4: memref<1x32x32xf32, #tpu.memory_space<vmem>>, %arg5: memref<1x32x64xf32, #tpu.memory_space<vmem>>, %arg6: memref<1x32x32xf32, #tpu.memory_space<vmem>>, %arg7: memref<1x6x32xf32, #tpu.memory_space<vmem>>, %arg8: memref<1x8x32xf32, #tpu.memory_space<vmem>>, %arg9: memref<1x8x32xf32, #tpu.memory_space<vmem>>) attributes {dimension_semantics = [#tpu.dimension_semantics<parallel>, #tpu.dimension_semantics<arbitrary>], iteration_bounds = array<i64: 2, 2>, scalar_prefetch = 0 : i64, scratch_operands = 1 : i64, tpu.core_type = #tpu.core_type<tc>, window_params = [{transform_indices = @transform_0, window_bounds = array<i64: 1, 8, 32>}, {transform_indices = @transform_1, window_bounds = array<i64: 1, 16, 32>}, {transform_indices = @transform_2, window_bounds = array<i64: 1, 32, 32>}, {transform_indices = @transform_3, window_bounds = array<i64: 1, 32, 64>}, {transform_indices = @transform_4, window_bounds = array<i64: 1, 32, 32>}, {transform_indices = @transform_5, window_bounds = array<i64: 1, 6, 32>}, {transform_indices = @transform_6, window_bounds = array<i64: 1, 8, 32>}]} {
    %c0_i32 = arith.constant 0 : i32
    %0 = arith.cmpi eq, %arg1, %c0_i32 : i32
    %1 = arith.extui %0 : i1 to i32
    %c0_i32_0 = arith.constant 0 : i32
    %2 = arith.cmpi ne, %1, %c0_i32_0 : i32
    scf.if %2 {
      %c0_33 = arith.constant 0 : index
      %c0_34 = arith.constant 0 : index
      %c0_35 = arith.constant 0 : index
      %151 = vector.load %arg2[%c0_33, %c0_34, %c0_35] : memref<1x8x32xf32, #tpu.memory_space<vmem>>, vector<1x8x32xf32>
      %c0_36 = arith.constant 0 : index
      %c0_37 = arith.constant 0 : index
      %c0_38 = arith.constant 0 : index
      %152 = vector.load %arg9[%c0_36, %c0_37, %c0_38] : memref<1x8x32xf32, #tpu.memory_space<vmem>>, vector<1x8x32xf32>
      tpu.vector_store %arg9[%c0_36, %c0_37, %c0_38], %151 {strides = array<i32>} : memref<1x8x32xf32, #tpu.memory_space<vmem>>, vector<1x8x32xf32>,
    } else {
    }
    %c0 = arith.constant 0 : index
    %c0_1 = arith.constant 0 : index
    %c0_2 = arith.constant 0 : index
    %3 = vector.load %arg9[%c0, %c0_1, %c0_2] : memref<1x8x32xf32, #tpu.memory_space<vmem>>, vector<1x8x32xf32>
    %c0_3 = arith.constant 0 : index
    %c0_4 = arith.constant 0 : index
    %c0_5 = arith.constant 0 : index
    %4 = vector.load %arg3[%c0_3, %c0_4, %c0_5] : memref<1x16x32xf32, #tpu.memory_space<vmem>>, vector<1x16x32xf32>
    %c0_6 = arith.constant 0 : index
    %c0_7 = arith.constant 0 : index
    %c0_8 = arith.constant 0 : index
    %5 = vector.load %arg4[%c0_6, %c0_7, %c0_8] : memref<1x32x32xf32, #tpu.memory_space<vmem>>, vector<1x32x32xf32>
    %6 = vector.shape_cast %5 : vector<1x32x32xf32> to vector<32x32xf32>
    %c0_9 = arith.constant 0 : index
    %c0_10 = arith.constant 0 : index
    %c0_11 = arith.constant 0 : index
    %7 = vector.load %arg5[%c0_9, %c0_10, %c0_11] : memref<1x32x64xf32, #tpu.memory_space<vmem>>, vector<1x32x64xf32>
    %8 = vector.shape_cast %7 : vector<1x32x64xf32> to vector<32x64xf32>
    %c0_12 = arith.constant 0 : index
    %c0_13 = arith.constant 0 : index
    %c0_14 = arith.constant 0 : index
    %9 = vector.load %arg6[%c0_12, %c0_13, %c0_14] : memref<1x32x32xf32, #tpu.memory_space<vmem>>, vector<1x32x32xf32>
    %10 = vector.shape_cast %9 : vector<1x32x32xf32> to vector<32x32xf32>
    %c0_15 = arith.constant 0 : index
    %c0_16 = arith.constant 0 : index
    %c0_17 = arith.constant 0 : index
    %11 = vector.load %arg7[%c0_15, %c0_16, %c0_17] : memref<1x6x32xf32, #tpu.memory_space<vmem>>, vector<1x6x32xf32>
    %12 = vector.shape_cast %11 : vector<1x6x32xf32> to vector<6x32xf32>
    %13 = vector.shape_cast %3 : vector<1x8x32xf32> to vector<8x32xf32>
    %14 = vector.shape_cast %4 : vector<1x16x32xf32> to vector<16x32xf32>
    %cst = arith.constant dense<0.000000e+00> : vector<8x32xf32>
    %15 = tpu.matmul %13, %6, %cst {dimension_numbers = #tpu.dot_dimension_numbers<[1], [0], [0], [1], [0, 0, 1, 1], [], []>} : vector<8x32xf32>, vector<32x32xf32>, vector<8x32xf32> -> vector<8x32xf32>
    %16 = vector.extract_strided_slice %12 {offsets = [0, 0], sizes = [1, 32], strides = [1, 1]} : vector<6x32xf32> to vector<1x32xf32>
    %17 = vector.broadcast %16 : vector<1x32xf32> to vector<8x32xf32>
    %18 = arith.addf %15, %17 : vector<8x32xf32>
    %cst_18 = arith.constant dense<0.000000e+00> : vector<16x64xf32>
    %19 = tpu.matmul %14, %8, %cst_18 {dimension_numbers = #tpu.dot_dimension_numbers<[1], [0], [0], [1], [0, 0, 1, 1], [], []>} : vector<16x32xf32>, vector<32x64xf32>, vector<16x64xf32> -> vector<16x64xf32>
    %20 = vector.extract_strided_slice %19 {offsets = [0, 0], sizes = [16, 32], strides = [1, 1]} : vector<16x64xf32> to vector<16x32xf32>
    %21 = vector.extract_strided_slice %12 {offsets = [1, 0], sizes = [1, 32], strides = [1, 1]} : vector<6x32xf32> to vector<1x32xf32>
    %22 = vector.broadcast %21 : vector<1x32xf32> to vector<16x32xf32>
    %23 = arith.addf %20, %22 : vector<16x32xf32>
    %24 = vector.extract_strided_slice %19 {offsets = [0, 32], sizes = [16, 32], strides = [1, 1]} : vector<16x64xf32> to vector<16x32xf32>
    %25 = vector.extract_strided_slice %12 {offsets = [2, 0], sizes = [1, 32], strides = [1, 1]} : vector<6x32xf32> to vector<1x32xf32>
    %26 = vector.broadcast %25 : vector<1x32xf32> to vector<16x32xf32>
    %27 = arith.addf %24, %26 : vector<16x32xf32>
    %28 = vector.shape_cast %18 : vector<8x32xf32> to vector<1x8x32xf32>
    %29 = vector.extract_strided_slice %28 {offsets = [0, 0, 0], sizes = [1, 8, 4], strides = [1, 1, 1]} : vector<1x8x32xf32> to vector<1x8x4xf32>
    %30 = vector.extract_strided_slice %28 {offsets = [0, 0, 4], sizes = [1, 8, 4], strides = [1, 1, 1]} : vector<1x8x32xf32> to vector<1x8x4xf32>
    %31 = vector.extract_strided_slice %28 {offsets = [0, 0, 8], sizes = [1, 8, 4], strides = [1, 1, 1]} : vector<1x8x32xf32> to vector<1x8x4xf32>
    %32 = vector.extract_strided_slice %28 {offsets = [0, 0, 12], sizes = [1, 8, 4], strides = [1, 1, 1]} : vector<1x8x32xf32> to vector<1x8x4xf32>
    %33 = vector.extract_strided_slice %28 {offsets = [0, 0, 16], sizes = [1, 8, 4], strides = [1, 1, 1]} : vector<1x8x32xf32> to vector<1x8x4xf32>
    %34 = vector.extract_strided_slice %28 {offsets = [0, 0, 20], sizes = [1, 8, 4], strides = [1, 1, 1]} : vector<1x8x32xf32> to vector<1x8x4xf32>
    %35 = vector.extract_strided_slice %28 {offsets = [0, 0, 24], sizes = [1, 8, 4], strides = [1, 1, 1]} : vector<1x8x32xf32> to vector<1x8x4xf32>
    %36 = vector.extract_strided_slice %28 {offsets = [0, 0, 28], sizes = [1, 8, 4], strides = [1, 1, 1]} : vector<1x8x32xf32> to vector<1x8x4xf32>
    %37 = vector.shape_cast %29 : vector<1x8x4xf32> to vector<1x1x8x4xf32>
    %38 = vector.shape_cast %30 : vector<1x8x4xf32> to vector<1x1x8x4xf32>
    %39 = vector.shape_cast %31 : vector<1x8x4xf32> to vector<1x1x8x4xf32>
    %40 = vector.shape_cast %32 : vector<1x8x4xf32> to vector<1x1x8x4xf32>
    %41 = vector.shape_cast %33 : vector<1x8x4xf32> to vector<1x1x8x4xf32>
    %42 = vector.shape_cast %34 : vector<1x8x4xf32> to vector<1x1x8x4xf32>
    %43 = vector.shape_cast %35 : vector<1x8x4xf32> to vector<1x1x8x4xf32>
    %44 = vector.shape_cast %36 : vector<1x8x4xf32> to vector<1x1x8x4xf32>
    %45 = tpu.concatenate %37, %38, %39, %40, %41, %42, %43, %44 in 1 : vector<1x1x8x4xf32>, vector<1x1x8x4xf32>, vector<1x1x8x4xf32>, vector<1x1x8x4xf32>, vector<1x1x8x4xf32>, vector<1x1x8x4xf32>, vector<1x1x8x4xf32>, vector<1x1x8x4xf32> -> vector<1x8x8x4xf32>
    %46 = vector.shape_cast %45 : vector<1x8x8x4xf32> to vector<8x8x4xf32>
    %47 = vector.shape_cast %23 : vector<16x32xf32> to vector<1x16x32xf32>
    %48 = vector.extract_strided_slice %47 {offsets = [0, 0, 0], sizes = [1, 16, 4], strides = [1, 1, 1]} : vector<1x16x32xf32> to vector<1x16x4xf32>
    %49 = vector.extract_strided_slice %47 {offsets = [0, 0, 4], sizes = [1, 16, 4], strides = [1, 1, 1]} : vector<1x16x32xf32> to vector<1x16x4xf32>
    %50 = vector.extract_strided_slice %47 {offsets = [0, 0, 8], sizes = [1, 16, 4], strides = [1, 1, 1]} : vector<1x16x32xf32> to vector<1x16x4xf32>
    %51 = vector.extract_strided_slice %47 {offsets = [0, 0, 12], sizes = [1, 16, 4], strides = [1, 1, 1]} : vector<1x16x32xf32> to vector<1x16x4xf32>
    %52 = vector.extract_strided_slice %47 {offsets = [0, 0, 16], sizes = [1, 16, 4], strides = [1, 1, 1]} : vector<1x16x32xf32> to vector<1x16x4xf32>
    %53 = vector.extract_strided_slice %47 {offsets = [0, 0, 20], sizes = [1, 16, 4], strides = [1, 1, 1]} : vector<1x16x32xf32> to vector<1x16x4xf32>
    %54 = vector.extract_strided_slice %47 {offsets = [0, 0, 24], sizes = [1, 16, 4], strides = [1, 1, 1]} : vector<1x16x32xf32> to vector<1x16x4xf32>
    %55 = vector.extract_strided_slice %47 {offsets = [0, 0, 28], sizes = [1, 16, 4], strides = [1, 1, 1]} : vector<1x16x32xf32> to vector<1x16x4xf32>
    %56 = vector.shape_cast %48 : vector<1x16x4xf32> to vector<1x1x16x4xf32>
    %57 = vector.shape_cast %49 : vector<1x16x4xf32> to vector<1x1x16x4xf32>
    %58 = vector.shape_cast %50 : vector<1x16x4xf32> to vector<1x1x16x4xf32>
    %59 = vector.shape_cast %51 : vector<1x16x4xf32> to vector<1x1x16x4xf32>
    %60 = vector.shape_cast %52 : vector<1x16x4xf32> to vector<1x1x16x4xf32>
    %61 = vector.shape_cast %53 : vector<1x16x4xf32> to vector<1x1x16x4xf32>
    %62 = vector.shape_cast %54 : vector<1x16x4xf32> to vector<1x1x16x4xf32>
    %63 = vector.shape_cast %55 : vector<1x16x4xf32> to vector<1x1x16x4xf32>
    %64 = tpu.concatenate %56, %57, %58, %59, %60, %61, %62, %63 in 1 : vector<1x1x16x4xf32>, vector<1x1x16x4xf32>, vector<1x1x16x4xf32>, vector<1x1x16x4xf32>, vector<1x1x16x4xf32>, vector<1x1x16x4xf32>, vector<1x1x16x4xf32>, vector<1x1x16x4xf32> -> vector<1x8x16x4xf32>
    %65 = vector.shape_cast %64 : vector<1x8x16x4xf32> to vector<8x16x4xf32>
    %66 = vector.shape_cast %27 : vector<16x32xf32> to vector<1x16x32xf32>
    %67 = vector.extract_strided_slice %66 {offsets = [0, 0, 0], sizes = [1, 16, 4], strides = [1, 1, 1]} : vector<1x16x32xf32> to vector<1x16x4xf32>
    %68 = vector.extract_strided_slice %66 {offsets = [0, 0, 4], sizes = [1, 16, 4], strides = [1, 1, 1]} : vector<1x16x32xf32> to vector<1x16x4xf32>
    %69 = vector.extract_strided_slice %66 {offsets = [0, 0, 8], sizes = [1, 16, 4], strides = [1, 1, 1]} : vector<1x16x32xf32> to vector<1x16x4xf32>
    %70 = vector.extract_strided_slice %66 {offsets = [0, 0, 12], sizes = [1, 16, 4], strides = [1, 1, 1]} : vector<1x16x32xf32> to vector<1x16x4xf32>
    %71 = vector.extract_strided_slice %66 {offsets = [0, 0, 16], sizes = [1, 16, 4], strides = [1, 1, 1]} : vector<1x16x32xf32> to vector<1x16x4xf32>
    %72 = vector.extract_strided_slice %66 {offsets = [0, 0, 20], sizes = [1, 16, 4], strides = [1, 1, 1]} : vector<1x16x32xf32> to vector<1x16x4xf32>
    %73 = vector.extract_strided_slice %66 {offsets = [0, 0, 24], sizes = [1, 16, 4], strides = [1, 1, 1]} : vector<1x16x32xf32> to vector<1x16x4xf32>
    %74 = vector.extract_strided_slice %66 {offsets = [0, 0, 28], sizes = [1, 16, 4], strides = [1, 1, 1]} : vector<1x16x32xf32> to vector<1x16x4xf32>
    %75 = vector.shape_cast %67 : vector<1x16x4xf32> to vector<1x1x16x4xf32>
    %76 = vector.shape_cast %68 : vector<1x16x4xf32> to vector<1x1x16x4xf32>
    %77 = vector.shape_cast %69 : vector<1x16x4xf32> to vector<1x1x16x4xf32>
    %78 = vector.shape_cast %70 : vector<1x16x4xf32> to vector<1x1x16x4xf32>
    %79 = vector.shape_cast %71 : vector<1x16x4xf32> to vector<1x1x16x4xf32>
    %80 = vector.shape_cast %72 : vector<1x16x4xf32> to vector<1x1x16x4xf32>
    %81 = vector.shape_cast %73 : vector<1x16x4xf32> to vector<1x1x16x4xf32>
    %82 = vector.shape_cast %74 : vector<1x16x4xf32> to vector<1x1x16x4xf32>
    %83 = tpu.concatenate %75, %76, %77, %78, %79, %80, %81, %82 in 1 : vector<1x1x16x4xf32>, vector<1x1x16x4xf32>, vector<1x1x16x4xf32>, vector<1x1x16x4xf32>, vector<1x1x16x4xf32>, vector<1x1x16x4xf32>, vector<1x1x16x4xf32>, vector<1x1x16x4xf32> -> vector<1x8x16x4xf32>
    %84 = vector.shape_cast %83 : vector<1x8x16x4xf32> to vector<8x16x4xf32>
    "tpu.trace_start"() <{level = 10 : i32, message = "gqd,gkd->gqk"}> : () -> ()
    %cst_19 = arith.constant dense<0.000000e+00> : vector<8x8x16xf32>
    %85 = tpu.matmul %46, %65, %cst_19 {dimension_numbers = #tpu.dot_dimension_numbers<[2], [2], [1], [1], [0, 0, 0, 1, 1, 1], [0], [0]>} : vector<8x8x4xf32>, vector<8x16x4xf32>, vector<8x8x16xf32> -> vector<8x8x16xf32>
    "tpu.trace_stop"() : () -> ()
    %cst_20 = arith.constant dense<0xFF800000> : vector<8x8xf32>
    %86 = vector.multi_reduction <maximumf>, %85, %cst_20 [2] : vector<8x8x16xf32> to vector<8x8xf32>
    %87 = vector.shape_cast %86 : vector<8x8xf32> to vector<8x8x1xf32>
    %88 = vector.broadcast %87 : vector<8x8x1xf32> to vector<8x8x16xf32>
    %89 = arith.subf %85, %88 : vector<8x8x16xf32>
    %90 = math.exp %89 : vector<8x8x16xf32>
    %cst_21 = arith.constant dense<0.000000e+00> : vector<8x8xf32>
    %91 = vector.multi_reduction <add>, %90, %cst_21 [2] : vector<8x8x16xf32> to vector<8x8xf32>
    %92 = vector.shape_cast %91 : vector<8x8xf32> to vector<8x8x1xf32>
    %93 = vector.broadcast %92 : vector<8x8x1xf32> to vector<8x8x16xf32>
    %94 = arith.divf %90, %93 : vector<8x8x16xf32>
    "tpu.trace_start"() <{level = 10 : i32, message = "gqk,gkd->gqd"}> : () -> ()
    %cst_22 = arith.constant dense<0.000000e+00> : vector<8x8x4xf32>
    %95 = tpu.matmul %94, %84, %cst_22 {dimension_numbers = #tpu.dot_dimension_numbers<[2], [1], [1], [2], [0, 0, 0, 1, 1, 2], [0], [0]>} : vector<8x8x16xf32>, vector<8x16x4xf32>, vector<8x8x4xf32> -> vector<8x8x4xf32>
    "tpu.trace_stop"() : () -> ()
    %96 = vector.shape_cast %95 : vector<8x8x4xf32> to vector<1x8x8x4xf32>
    %97 = vector.extract_strided_slice %96 {offsets = [0, 0, 0, 0], sizes = [1, 1, 8, 4], strides = [1, 1, 1, 1]} : vector<1x8x8x4xf32> to vector<1x1x8x4xf32>
    %98 = vector.shape_cast %97 : vector<1x1x8x4xf32> to vector<1x8x4xf32>
    %99 = vector.extract_strided_slice %96 {offsets = [0, 1, 0, 0], sizes = [1, 1, 8, 4], strides = [1, 1, 1, 1]} : vector<1x8x8x4xf32> to vector<1x1x8x4xf32>
    %100 = vector.shape_cast %99 : vector<1x1x8x4xf32> to vector<1x8x4xf32>
    %101 = vector.extract_strided_slice %96 {offsets = [0, 2, 0, 0], sizes = [1, 1, 8, 4], strides = [1, 1, 1, 1]} : vector<1x8x8x4xf32> to vector<1x1x8x4xf32>
    %102 = vector.shape_cast %101 : vector<1x1x8x4xf32> to vector<1x8x4xf32>
    %103 = vector.extract_strided_slice %96 {offsets = [0, 3, 0, 0], sizes = [1, 1, 8, 4], strides = [1, 1, 1, 1]} : vector<1x8x8x4xf32> to vector<1x1x8x4xf32>
    %104 = vector.shape_cast %103 : vector<1x1x8x4xf32> to vector<1x8x4xf32>
    %105 = vector.extract_strided_slice %96 {offsets = [0, 4, 0, 0], sizes = [1, 1, 8, 4], strides = [1, 1, 1, 1]} : vector<1x8x8x4xf32> to vector<1x1x8x4xf32>
    %106 = vector.shape_cast %105 : vector<1x1x8x4xf32> to vector<1x8x4xf32>
    %107 = vector.extract_strided_slice %96 {offsets = [0, 5, 0, 0], sizes = [1, 1, 8, 4], strides = [1, 1, 1, 1]} : vector<1x8x8x4xf32> to vector<1x1x8x4xf32>
    %108 = vector.shape_cast %107 : vector<1x1x8x4xf32> to vector<1x8x4xf32>
    %109 = vector.extract_strided_slice %96 {offsets = [0, 6, 0, 0], sizes = [1, 1, 8, 4], strides = [1, 1, 1, 1]} : vector<1x8x8x4xf32> to vector<1x1x8x4xf32>
    %110 = vector.shape_cast %109 : vector<1x1x8x4xf32> to vector<1x8x4xf32>
    %111 = vector.extract_strided_slice %96 {offsets = [0, 7, 0, 0], sizes = [1, 1, 8, 4], strides = [1, 1, 1, 1]} : vector<1x8x8x4xf32> to vector<1x1x8x4xf32>
    %112 = vector.shape_cast %111 : vector<1x1x8x4xf32> to vector<1x8x4xf32>
    %113 = tpu.concatenate %98, %100, %102, %104, %106, %108, %110, %112 in 2 : vector<1x8x4xf32>, vector<1x8x4xf32>, vector<1x8x4xf32>, vector<1x8x4xf32>, vector<1x8x4xf32>, vector<1x8x4xf32>, vector<1x8x4xf32>, vector<1x8x4xf32> -> vector<1x8x32xf32>
    %114 = vector.shape_cast %113 : vector<1x8x32xf32> to vector<8x32xf32>
    %cst_23 = arith.constant dense<0.000000e+00> : vector<8x32xf32>
    %115 = tpu.matmul %114, %10, %cst_23 {dimension_numbers = #tpu.dot_dimension_numbers<[1], [0], [0], [1], [0, 0, 1, 1], [], []>} : vector<8x32xf32>, vector<32x32xf32>, vector<8x32xf32> -> vector<8x32xf32>
    %116 = vector.extract_strided_slice %12 {offsets = [3, 0], sizes = [1, 32], strides = [1, 1]} : vector<6x32xf32> to vector<1x32xf32>
    %117 = vector.broadcast %116 : vector<1x32xf32> to vector<8x32xf32>
    %118 = arith.addf %115, %117 : vector<8x32xf32>
    %119 = vector.shape_cast %118 : vector<8x32xf32> to vector<1x8x32xf32>
    %120 = arith.addf %119, %3 : vector<1x8x32xf32>
    %cst_24 = arith.constant dense<0.000000e+00> : vector<1x8xf32>
    %121 = vector.multi_reduction <add>, %120, %cst_24 [2] : vector<1x8x32xf32> to vector<1x8xf32>
    %122 = vector.shape_cast %121 : vector<1x8xf32> to vector<1x8x1xf32>
    %cst_25 = arith.constant 3.200000e+01 : f32
    %123 = vector.broadcast %cst_25 : f32 to vector<1x8x1xf32>
    %124 = arith.divf %122, %123 : vector<1x8x1xf32>
    %125 = vector.broadcast %124 : vector<1x8x1xf32> to vector<1x8x32xf32>
    %126 = arith.subf %120, %125 : vector<1x8x32xf32>
    %127 = arith.mulf %126, %126 : vector<1x8x32xf32>
    %cst_26 = arith.constant dense<0.000000e+00> : vector<1x8xf32>
    %128 = vector.multi_reduction <add>, %127, %cst_26 [2] : vector<1x8x32xf32> to vector<1x8xf32>
    %129 = vector.shape_cast %128 : vector<1x8xf32> to vector<1x8x1xf32>
    %cst_27 = arith.constant 3.200000e+01 : f32
    %130 = vector.broadcast %cst_27 : f32 to vector<1x8x1xf32>
    %131 = arith.divf %129, %130 : vector<1x8x1xf32>
    %132 = vector.broadcast %124 : vector<1x8x1xf32> to vector<1x8x32xf32>
    %133 = arith.subf %120, %132 : vector<1x8x32xf32>
    %cst_28 = arith.constant 9.99999974E-6 : f32
    %134 = vector.broadcast %cst_28 : f32 to vector<1x8x1xf32>
    %135 = arith.addf %131, %134 : vector<1x8x1xf32>
    %136 = math.rsqrt %135 : vector<1x8x1xf32>
    %137 = vector.broadcast %136 : vector<1x8x1xf32> to vector<1x8x32xf32>
    %138 = arith.mulf %133, %137 : vector<1x8x32xf32>
    %139 = vector.extract_strided_slice %12 {offsets = [4, 0], sizes = [1, 32], strides = [1, 1]} : vector<6x32xf32> to vector<1x32xf32>
    %140 = vector.shape_cast %139 : vector<1x32xf32> to vector<1x1x32xf32>
    %141 = vector.broadcast %140 : vector<1x1x32xf32> to vector<1x8x32xf32>
    %142 = arith.mulf %138, %141 : vector<1x8x32xf32>
    %143 = vector.extract_strided_slice %12 {offsets = [5, 0], sizes = [1, 32], strides = [1, 1]} : vector<6x32xf32> to vector<1x32xf32>
    %144 = vector.shape_cast %143 : vector<1x32xf32> to vector<1x1x32xf32>
    %145 = vector.broadcast %144 : vector<1x1x32xf32> to vector<1x8x32xf32>
    %146 = arith.addf %142, %145 : vector<1x8x32xf32>
    %c0_29 = arith.constant 0 : index
    %c0_30 = arith.constant 0 : index
    %c0_31 = arith.constant 0 : index
    %147 = vector.load %arg9[%c0_29, %c0_30, %c0_31] : memref<1x8x32xf32, #tpu.memory_space<vmem>>, vector<1x8x32xf32>
    tpu.vector_store %arg9[%c0_29, %c0_30, %c0_31], %146 {strides = array<i32>} : memref<1x8x32xf32, #tpu.memory_space<vmem>>, vector<1x8x32xf32>,
    %c1_i32 = arith.constant 1 : i32
    %148 = arith.cmpi eq, %arg1, %c1_i32 : i32
    %149 = arith.extui %148 : i1 to i32
    %c0_i32_32 = arith.constant 0 : i32
    %150 = arith.cmpi ne, %149, %c0_i32_32 : i32
    scf.if %150 {
      %c0_33 = arith.constant 0 : index
      %c0_34 = arith.constant 0 : index
      %c0_35 = arith.constant 0 : index
      %151 = vector.load %arg8[%c0_33, %c0_34, %c0_35] : memref<1x8x32xf32, #tpu.memory_space<vmem>>, vector<1x8x32xf32>
      tpu.vector_store %arg8[%c0_33, %c0_34, %c0_35], %146 {strides = array<i32>} : memref<1x8x32xf32, #tpu.memory_space<vmem>>, vector<1x8x32xf32>,
    } else {
    }
    return
  }
  func.func @transform_0(%arg0: i32, %arg1: i32) -> (i32, i32, i32) {
    %c0_i32 = arith.constant 0 : i32
    %c0_i32_0 = arith.constant 0 : i32
    %c0_i32_1 = arith.constant 0 : i32
    return %arg0, %c0_i32, %c0_i32_0 : i32, i32, i32
  }
  func.func @transform_1(%arg0: i32, %arg1: i32) -> (i32, i32, i32) {
    %c0_i32 = arith.constant 0 : i32
    %c0_i32_0 = arith.constant 0 : i32
    %c0_i32_1 = arith.constant 0 : i32
    return %arg0, %c0_i32, %c0_i32_0 : i32, i32, i32
  }
  func.func @transform_2(%arg0: i32, %arg1: i32) -> (i32, i32, i32) {
    %c0_i32 = arith.constant 0 : i32
    %c0_i32_0 = arith.constant 0 : i32
    %c0_i32_1 = arith.constant 0 : i32
    return %arg1, %c0_i32, %c0_i32_0 : i32, i32, i32
  }
  func.func @transform_3(%arg0: i32, %arg1: i32) -> (i32, i32, i32) {
    %c0_i32 = arith.constant 0 : i32
    %c0_i32_0 = arith.constant 0 : i32
    %c0_i32_1 = arith.constant 0 : i32
    return %arg1, %c0_i32, %c0_i32_0 : i32, i32, i32
  }
  func.func @transform_4(%arg0: i32, %arg1: i32) -> (i32, i32, i32) {
    %c0_i32 = arith.constant 0 : i32
    %c0_i32_0 = arith.constant 0 : i32
    %c0_i32_1 = arith.constant 0 : i32
    return %arg1, %c0_i32, %c0_i32_0 : i32, i32, i32
  }
  func.func @transform_5(%arg0: i32, %arg1: i32) -> (i32, i32, i32) {
    %c0_i32 = arith.constant 0 : i32
    %c0_i32_0 = arith.constant 0 : i32
    %c0_i32_1 = arith.constant 0 : i32
    return %arg1, %c0_i32, %c0_i32_0 : i32, i32, i32
  }
  func.func @transform_6(%arg0: i32, %arg1: i32) -> (i32, i32, i32) {
    %c0_i32 = arith.constant 0 : i32
    %c0_i32_0 = arith.constant 0 : i32
    %c0_i32_1 = arith.constant 0 : i32
    return %arg0, %c0_i32, %c0_i32_0 : i32, i32, i32
  }
}

</mosaic_0001>

<bundles_post_ra>
// kernel: tpu_custom_call.1
= control target key start
LH: loop header
LB: loop body
LE: loop exit
PB: predicated region body
PF: predicated region fallthrough
CT: control target
= control target key end

     0   :  { %s3725_s0 = inlined_call_operand.vmem [shape: f32[2,8,32], index: 0, kind: input, shape index: {}]   ;;  %s3726_s1 = inlined_call_operand.hbm [shape: f32[2,16,32], index: 1, kind: input, shape index: {}]   ;;  %s3727_s2 = inlined_call_operand.hbm [shape: f32[2,32,32], index: 2, kind: input, shape index: {}]   ;;  %s3728_s3 = inlined_call_operand.hbm [shape: f32[2,32,64], index: 3, kind: input, shape index: {}]   ;;  %s3729_s4 = inlined_call_operand.hbm [shape: f32[2,32,32], index: 4, kind: input, shape index: {}]   ;;  %s3730_s5 = inlined_call_operand.vmem [shape: f32[2,6,32], index: 5, kind: input, shape index: {}]   ;;  %s3731_s6 = inlined_call_operand.hbm [shape: f32[2,8,32], index: 6, kind: output, shape index: {}]  }
   0x1   :  { %3751 = sst [smem:[#allocation27_spill]] %s3725_s0 }
   0x2   :  { %3752 = sst [smem:[#allocation28_spill]] %s3727_s2 }
   0x3   :  { %3753 = sst [smem:[#allocation29_spill]] %s3730_s5 }
   0x4   :  { %3754 = sst [smem:[#allocation30_spill]] %s3731_s6 }
   0x5   :  { %11 = vsyncpa [#allocation4], 0 }
   0x6   :  { %13 = vsyncpa [#allocation4 + $0x1], 0 }
   0x7   :  { %14 = vsyncpa [#allocation7], 0 }
   0x8   :  { %16 = vsyncpa [#allocation7 + $0x1], 0 }
   0x9   :  { %17 = vsyncpa [#allocation10], 0 }
   0xa   :  { %19 = vsyncpa [#allocation10 + $0x1], 0 }
   0xb   :  { %20 = vsyncpa [#allocation5], 0 }
   0xc   :  { %22 = vsyncpa [#allocation5 + $0x1], 0  ;;  %s3121_s21 = smov 0   ;;  %s3123_s22 = smov 0  }
   0xd   :  { %s3125_s23 = smov 0   ;;  %s3127_s24 = smov 0  }
   0xe   :  { %s3129_s25 = smov 0   ;;  %s3131_s26 = smov 0  }
   0xf   :  { %s3133_s27 = smov 0   ;;  %s3135_s28 = smov 0  }
  0x10   :  { %s3137_s29 = smov 0   ;;  %s3139_s30 = smov 0  }
  0x11   :  { %s3141_s7 = smov 0  }
  0x12 LB: > { %3755 = sst [smem:[#allocation16_spill]] %s3039_s26  ;;  %s37_s8 = sadd.s32 1, %s3051_s29  ;;  %s3059_s7 = sphi %s3141_s7, %s28_s7   ;;  %s3055_s30 = sphi %s3139_s30, %s3799_s30   ;;  %s3051_s29 = sphi %s3137_s29, %s3798_s29   ;;  %s3047_s28 = sphi %s3135_s28, %s3797_s28   ;;  %s3043_s27 = sphi %s3133_s27, %s3796_s27   ;;  %s3039_s26 = sphi %s3131_s26, %s3795_s26   ;;  %s3035_s25 = sphi %s3129_s25, %s3804_s25   ;;  %s3031_s24 = sphi %s3127_s24, %s3803_s24   ;;  %s3027_s23 = sphi %s3125_s23, %s3802_s23   ;;  %s3023_s22 = sphi %s3123_s22, %s3801_s22   ;;  %s3019_s21 = sphi %s3121_s21, %s3800_s21  }
  0x13   : > { %3756 = sst [smem:[#allocation17_spill]] %s3043_s27  ;;  %p81_p0 = scmp.eq.s32.totalorder %s3059_s7, 0 }
  0x14   : > { %3757 = sst [smem:[#allocation18_spill]] %s3047_s28  ;;  %p3178_p1 = scmp.ge.s32.totalorder %s37_s8, 2 }
  0x15   : > { %3758 = sst [smem:[#allocation19_spill]] %s3051_s29  ;;  %s99_s10 = sadd.s32 1, %s3027_s23 }
  0x16   : > { %3759 = sst [smem:[#allocation20_spill]] %s3055_s30  ;;  %p106_p2 = scmp.ne.s32.totalorder %s3027_s23, %s3023_s22 }
  0x17   : > { %p112_p3 = scmp.ne.s32.totalorder %s3023_s22, %s3019_s21  ;;  %s3806_s8 = smov (%p3178_p1, %s37_s8), 0 }
  0x18   : > { %3761 = sst [smem:[#allocation21_spill]] %s3806_s8  ;;  %p108_p4 = por %p106_p2, %p81_p0 }
  0x19   : > { %s96_s11 = ssub.s32 %s3051_s29, %s3806_s8  ;;  %p3734_p5 = scmp.lt.s32.totalorder %s3059_s7, 4 }
  0x1a   : > { %p97_p6 = scmp.eq.s32.totalorder %s96_s11, 0  ;;  %s268_s12 = sand.u32 1, %s3059_s7  }
  0x1b   : > { %s3733_s14 = sand.u32 1, %s3027_s23   ;;  %s3206_s16 = sshll.u32 %s3051_s29, 9 }
  0x1c   : > { %s3198_s13 = scalar_select %p97_p6, %s3027_s23, %s99_s10  }
  0x1d   : > { %s3203_s15 = sshll.u32 %s3733_s14, 5  ;;  %s3763_s2 = sld [smem:[#allocation28_spill]] }
  0x1e   : > { %3762 = sst [smem:[#allocation22_spill]] %s3198_s13  ;;  %s272_s20 = scalar_lea.vmem [#allocation6], %s3203_s15 }
  0x1f   : > { %s279_s6 = sshll.u32 %s272_s20, 4  ;;  %p3215_p7 = pnand %p3734_p5, %p108_p4  ;;  %s280_s6 = int_to_ptr.vmem [resolvable:$true] %s279_s6 }
  0x20   : > { %p2385_p8 = scmp.ge.s32.totalorder %s3059_s7, 1  ;;  %p336_p9 = scmp.lt.s32.totalorder %s3059_s7, 5 }
  0x21   : > { %s3221_s10 = scalar_lea.sflag [#allocation7], %s268_s12  ;;  %p3741_p10 = pneg %p3215_p7 }
  0x22   : > { %s2832_s14 = scalar_lea.vmem %s280_s6, 512  ;;  %s3061_s17 = smov [#allocation6]  }
  0x23   : > { %s278_s19 = scalar_lea.hbm %s3763_s2, %s3206_s16  ;;  %p2833_p11 = scmp.ne.s32.totalorder %s280_s6, %s2832_s14 }
  0x24   : > { %s2837_s18 = sshll.u32 %s3061_s17, 4  ;;  %s2838_s18 = int_to_ptr.vmem [resolvable:$false] %s2837_s18 }
  0x25   : > { %p2835_p12 = pnand %p2833_p11, %p3741_p10  ;;  %s2839_s20 = scalar_lea.vmem %s2838_s18, 1024 }
  0x26   : > { %p2840_p2 = scmp.lt.s32.totalorder %s280_s6, %s2838_s18  ;;  %p2841_p4 = scmp.lt.s32.totalorder %s2839_s20, %s2832_s14 }
  0x27   : > { %p2836_p13 = pneg %p2835_p12 }
  0x28   : > { %p2842_p6 = por %p2841_p4, %p2840_p2 }
  0x2a   : > { %p2843_p5 = pnand %p2842_p6, %p2836_p13 }
  0x2c   : > { %2846 = shalt.err (!%p2843_p5)
}
  0x2d   : > { %s3736_s2 = smov 128   ;;  %s3738_s12 = smov 8  }
  0x2e   : > { %2664 = dma.hbm_to_vmem [thread:$0]  (!%p3215_p7), %s278_s19, 512, %s280_s6, %s3221_s10, %s3736_s2, %s3736_s2, %s3738_s12  }
  0x2f   : > { %p3238_p5 = pnand %p2385_p8, %p336_p9  ;;  %s3243_s17 = sadd.s32 4294967295, %s3059_s7  }
  0x30   : > { %s2370_s18 = sadd.s32 4294967294, %s3059_s7   ;;  %s40_s20 = sadd.s32 1, %s3055_s30 }
  0x31   : > { %s3808_s20 = smov (!%p3178_p1, %s40_s20), %s3055_s30  ;;  %s73_s8 = sadd.s32 1, %s3039_s26 }
  0x32   : > { %p80_p11 = scmp.ne.s32.totalorder %s3039_s26, %s3035_s25  ;;  %p42_p12 = scmp.ge.s32.totalorder %s3808_s20, 2 }
  0x33   : > { %p86_p8 = scmp.ne.s32.totalorder %s3035_s25, %s3031_s24  ;;  %p87_p13 = scmp.eq.s32.totalorder %s3243_s17, 0 }
  0x34   : > { %p3257_p9 = por %p81_p0, %p80_p11  ;;  %s3810_s20 = smov (%p42_p12, %s3808_s20), 0 }
  0x35   : > { %3767 = sst [smem:[#allocation23_spill]] %s3810_s20  ;;  %p3267_p1 = por %p87_p13, %p86_p8 }
  0x36   : > { %p3274_p2 = por %p112_p3, %p87_p13  ;;  %s70_s2 = ssub.s32 %s3055_s30, %s3810_s20 }
  0x37   : > { %p214_p0 = scmp.eq.s32.totalorder %s3243_s17, 3  ;;  %p71_p4 = scmp.eq.s32.totalorder %s70_s2, 0 }
  0x38   : > { %p220_p6 = scmp.eq.s32.totalorder %s2370_s18, 3  ;;  %s247_s29 = sand.u32 1, %s3039_s26  }
  0x39   : > { %p3281_p12 = por %p214_p0, %p80_p11  ;;  %s2373_s21 = sshll.u32 %s247_s29, 4 }
  0x3a   : > { %s3287_s13 = scalar_select %p71_p4, %s3039_s26, %s73_s8  }
  0x3b   : > { %s3770_s12 = scalar_select %p3281_p12, 1, 0 }
  0x3c   : > { %3772 = sst [smem:[#allocation25_spill]] %s3287_s13  ;;  %p3292_p10 = por %p220_p6, %p86_p8 }
  0x3d   : > { %3771 = sst [smem:[#allocation24_spill]] %s3770_s12  ;;  %s2435_s0 = sshll.u32 %s3055_s30, 8 }
  0x3e   : > { %s3773_s5 = scalar_select %p3292_p10, 1, 0 }
  0x3f   : > { %s257_s20 = scalar_lea.hbm %s3726_s1, %s2435_s0  ;;  %s251_s2 = scalar_lea.vmem [#allocation3], %s2373_s21 }
  0x40   : > { %3774 = sst [smem:[#allocation26_spill]] %s3773_s5  ;;  %s258_s18 = sshll.u32 %s251_s2, 4  ;;  %s259_s18 = int_to_ptr.vmem [resolvable:$true] %s258_s18 }
  0x41   : > { %p3775_p3 = scmp.lt.s32.totalorder %s3059_s7, 4  ;;  %s299_s26 = scalar_lea.hbm %s3728_s3, %s3206_s16 }
  0x42   : > { %s248_s5 = scalar_lea.sflag [#allocation4], %s247_s29  ;;  %s2860_s30 = scalar_lea.vmem %s259_s18, 256 }
  0x43   : > { %p3304_p11 = pnand %p3775_p3, %p3257_p9  ;;  %p2861_p13 = scmp.ne.s32.totalorder %s259_s18, %s2860_s30 }
  0x44   : > { %s3064_s0 = smov [#allocation3]  }
  0x45   : > { %p2849_p8 = pneg %p3304_p11  ;;  %s2865_s27 = sshll.u32 %s3064_s0, 4  ;;  %s2866_s27 = int_to_ptr.vmem [resolvable:$false] %s2865_s27 }
  0x46   : > { %s2867_s28 = scalar_lea.vmem %s2866_s27, 512  ;;  %p2868_p9 = scmp.lt.s32.totalorder %s259_s18, %s2866_s27 }
  0x47   : > { %p2863_p0 = pnand %p2861_p13, %p2849_p8  ;;  %p2869_p6 = scmp.lt.s32.totalorder %s2867_s28, %s2860_s30 }
  0x49   : > { %p2864_p4 = pneg %p2863_p0  ;;  %p2870_p3 = por %p2869_p6, %p2868_p9 }
  0x4b   : > { %p2871_p10 = pnand %p2870_p3, %p2864_p4 }
  0x4d   : > { %2874 = shalt.err (!%p2871_p10)
}
  0x4e   : > { %s3777_s13 = smov 8   ;;  %s3778_s6 = smov 128  }
  0x4f   : > { %2661 = dma.hbm_to_vmem [thread:$0]  (!%p3304_p11), %s257_s20, 256, %s259_s18, %s248_s5, %s3778_s6, %s3778_s6, %s3777_s13  }
  0x50   : > { %s293_s29 = scalar_lea.vmem [#allocation8], %s3203_s15  ;;  %p3779_p13 = pneg %p3215_p7 }
  0x51   : > { %s300_s21 = sshll.u32 %s293_s29, 4  ;;  %s3065_s30 = smov [#allocation8]   ;;  %s301_s21 = int_to_ptr.vmem [resolvable:$true] %s300_s21 }
  0x52   : > { %s2888_s2 = scalar_lea.vmem %s301_s21, 512  ;;  %s2893_s8 = sshll.u32 %s3065_s30, 4  ;;  %s2894_s8 = int_to_ptr.vmem [resolvable:$false] %s2893_s8 }
  0x53   : > { %p2889_p8 = scmp.ne.s32.totalorder %s301_s21, %s2888_s2  ;;  %s2895_s0 = scalar_lea.vmem %s2894_s8, 1024 }
  0x54   : > { %p2896_p10 = scmp.lt.s32.totalorder %s301_s21, %s2894_s8  ;;  %p2897_p4 = scmp.lt.s32.totalorder %s2895_s0, %s2888_s2 }
  0x55   : > { %p2891_p0 = pnand %p2889_p8, %p3779_p13 }
  0x56   : > { %p2898_p9 = por %p2897_p4, %p2896_p10 }
  0x57   : > { %p2892_p12 = pneg %p2891_p0 }
  0x59   : > { %p2899_p6 = pnand %p2898_p9, %p2892_p12 }
  0x5b   : > { %2902 = shalt.err (!%p2899_p6)
}
  0x5c   : > { %2667 = dma.hbm_to_vmem [thread:$0]  (!%p3215_p7), %s299_s26, 512, %s301_s21, %s3221_s10, %s3778_s6, %s3778_s6, %s3777_s13  }
  0x5d   : > { %s320_s27 = scalar_lea.hbm %s3729_s4, %s3206_s16  ;;  %s314_s28 = scalar_lea.vmem [#allocation9], %s3203_s15 }
  0x5e   : > { %s321_s29 = sshll.u32 %s314_s28, 4  ;;  %s3780_s2 = sand.u32 1, %s3027_s23   ;;  %s322_s29 = int_to_ptr.vmem [resolvable:$true] %s321_s29 }
  0x5f   : > { %s311_s30 = scalar_lea.sflag [#allocation10], %s3780_s2  ;;  %s2916_s8 = scalar_lea.vmem %s322_s29, 512 }
  0x60   : > { %p2917_p12 = scmp.ne.s32.totalorder %s322_s29, %s2916_s8  ;;  %p3781_p11 = pmov %p3779_p13 }
  0x61   : > { %s3066_s0 = smov [#allocation9]  }
  0x62   : > { %p2919_p3 = pnand %p2917_p12, %p3781_p11  ;;  %s2921_s5 = sshll.u32 %s3066_s0, 4  ;;  %s2922_s5 = int_to_ptr.vmem [resolvable:$false] %s2921_s5 }
  0x63   : > { %s2923_s12 = scalar_lea.vmem %s2922_s5, 1024  ;;  %p2924_p13 = scmp.lt.s32.totalorder %s322_s29, %s2922_s5 }
  0x64   : > { %p2920_p8 = pneg %p2919_p3  ;;  %p2925_p0 = scmp.lt.s32.totalorder %s2923_s12, %s2916_s8 }
  0x66   : > { %p2926_p10 = por %p2925_p0, %p2924_p13 }
  0x68   : > { %p2927_p4 = pnand %p2926_p10, %p2920_p8 }
  0x6a   : > { %2930 = shalt.err (!%p2927_p4)
}
  0x6b   : > { %2670 = dma.hbm_to_vmem [thread:$0]  (!%p3215_p7), %s320_s27, 512, %s322_s29, %s311_s30, %s3778_s6, %s3778_s6, %s3777_s13  }
  0x6c   : > { %340 = sbr.rel (%p3238_p5) target bundleno = 1878 (0x756), region = 44  ;;  %s3352_s26 = sand.u32 (!%p3238_p5), 1, %s3035_s25  }
  0x6d   : > { %s2386_s15 = sshll.u32 (!%p3238_p5), %s3352_s26, 4  ;;  %s343_s16 = scalar_lea.sflag (!%p3238_p5), [#allocation4], %s3352_s26 }
  0x6e   : > { %s3356_s10 = scalar_lea.vmem (!%p3238_p5), [#allocation3], %s2386_s15 }
  0x71   : > { %3002 = dma.done.wait (%p3267_p1), %s343_s16, 256  }
  0x72   : > { %3004 = vsyncadd (%p3267_p1), %s343_s16, 4294967040  ;;  %s351_s11 = sand.u32 1, %s3243_s17   ;;  %s353_s14 = sand.u32 1, %s3023_s22  }
  0x73   : > { %s2387_s13 = sshll.u32 %s353_s14, 5  ;;  %s352_s6 = scalar_lea.sflag [#allocation7], %s351_s11 }
  0x74   : > { %s3364_s21 = scalar_lea.vmem [#allocation6], %s2387_s13 }
  0x75   : > { %3006 = dma.done.wait (%p3274_p2), %s352_s6, 1024  }
  0x76   : > { %3008 = vsyncadd (%p3274_p2), %s352_s6, 4294966272  ;;  %s3370_s20 = scalar_lea.vmem [#allocation8], %s2387_s13  ;;  %s370_s18 = scalar_lea.sflag [#allocation10], %s353_s14 }
  0x77   : > { %s3372_s9 = scalar_lea.vmem [#allocation9], %s2387_s13 }
  0x78   : > { %3010 = dma.done.wait (%p3274_p2), %s370_s18, 512  }
  0x79   : > { %3012 = vsyncadd (%p3274_p2), %s370_s18, 4294966784  ;;  %s3782_s17 = sld [smem:[#allocation18_spill]]  ;;  %s2390_s28 = sshll.u32 %s3352_s26, 3 }
  0x7a   : > { %s3783_s27 = sld [smem:[#allocation17_spill]]  ;;  %s3391_s14 = scalar_lea.vmem [#allocation11], %s2390_s28 }
  0x7b   : > { %s3784_s0 = sld [smem:[#allocation27_spill]] }
  0x7c   : > { %s3785_s19 = sld [smem:[#allocation29_spill]] }
  0x7f   : > { %p425_p7 = scmp.lt.s32.totalorder %s3782_s17, 1 }
  0x80   : > { %p429_p5 = scmp.lt.s32.totalorder %s3783_s27, 1  ;;  %p2393_p1 = scmp.ne.s32.totalorder %s3783_s27, 0 }
  0x81   : > { %s3812_s17 = smov (!%p425_p7, %s3782_s17), 1 }
  0x82   : > { %s430_s29 = scalar_select %p429_p5, %s3783_s27, 1 }
  0x83   : > { %s2391_s2 = sshll.u32 %s3812_s17, 3  ;;  %436 = sbr.rel (%p2393_p1) target bundleno = 138 (0x8a), region = 64 }
  0x84   : > { %s428_s5 = scalar_lea.vmem %s3784_s0, %s2391_s2  ;;  %s2392_s12 = sshll.u32 %s430_s29, 3 }
  0x85   : > { %s3389_s11 = scalar_lea.vmem %s3785_s19, %s2392_s12 }
  0x88   : > { %v437_v0 = vld [vmem:[%s428_s5] sm:$0xff]  ;;  %vm438_vm0 = vcmask 261120  }
  0x89   : > { %439 = vst.msk [vmem:[#allocation2] sm:$0xff] %vm438_vm0, %v437_v0 }
  0x8a PF: > { %v450_v1 = vld [vmem:[%s3370_s20 + $0x18] sm:$0xff]  ;;  %v449_v2 = vld [vmem:[%s3370_s20 + $0x10] sm:$0xff]  ;;  %v3067_v3 = vmov 0.0   ;;  %v448_v6 = vld [vmem:[%s3370_s20 + $0x8] sm:$0xff]  ;;  %vm460_vm1 = vcmask 261120   ;;  %vm3068_vm2 = vmmov 0   ;;  %v456_v13 = vlaneseq }
  0x8b   : > { %2514 = vmatprep.subr.mxu1 %v450_v1  ;;  %2503 = vmatprep.subr.mxu0 %v3067_v3  ;;  %v446_v4 = vld [vmem:[%s3364_s21 + $0x18] sm:$0xff]  ;;  %v445_v5 = vld [vmem:[%s3364_s21 + $0x10] sm:$0xff]  ;;  %v447_v8 = vld [vmem:[%s3370_s20] sm:$0xff]  ;;  %vm706_vm3 = vcmask 31744   ;;  %s3070_s13 = smov 124   ;;  %s3071_s6 = smov 116  }
  0x8c   : > { %2515 = vmatpush3.msra.mxu1 %v450_v1  ;;  %2504 = vmatpush3.msra.mxu0 %v446_v4  ;;  %v441_v7 = vld [vmem:[%s3356_s10] sm:$0xff]  ;;  %v444_v9 = vld [vmem:[%s3364_s21 + $0x8] sm:$0xff]  ;;  %v3422_v14 = vshrl.u32 %v456_v13, 7  ;;  %v3426_v16 = vld [vmem:[%s3389_s11] sm:$0x3f]  ;;  %s3073_s20 = smov 108  }
  0x8d   : > { %2516 = vmatprep.subr.mxu1 %v449_v2  ;;  %2505 = vmatprep.subr.mxu0 %v3067_v3  ;;  %v442_v10 = vld [vmem:[%s3356_s10 + $0x8] sm:$0xff]  ;;  %v443_v11 = vld [vmem:[%s3364_s21] sm:$0xff]  ;;  %s3069_s10 = smov 120   ;;  %s3072_s21 = smov 112   ;;  %vm1315_vm4 = vcmask 130048   ;;  %vm2065_vm5 = vcmask 64512  }
  0x8e   : > { %2517 = vmatpush3.msra.mxu1 %v449_v2  ;;  %2506 = vmatpush3.msra.mxu0 %v445_v5  ;;  %v617_v15 = vsub.s32 1, %v3422_v14  ;;  %v458_v17 = vsub.s32 0, %v3422_v14  ;;  %s3074_s18 = smov 104   ;;  %s3075_s17 = smov 100   ;;  %v623_v27 = vsub.s32 2, %v3422_v14  ;;  %vm2067_vm6 = vcmask 97280  }
  0x8f   : > { %2518 = vmatprep.subr.mxu1 %v448_v6  ;;  %2522 = vmatprep.mubr.msk.f32.mxu1 %vm460_vm1, %v441_v7  ;;  %s3076_s27 = smov 32   ;;  %s3077_s28 = smov 96   ;;  %vm2070_vm7 = vcmask 162816   ;;  %vm2072_vm8 = vcmask 195584   ;;  %vm2074_vm9 = vcmask 228352  }
  0x90   : > { %2519 = vmatpush3.msra.mxu1 %v448_v6  ;;  %2507 = vmatprep.subr.mxu0 %v3067_v3  ;;  %v3409_v12 = vld [vmem:[#allocation2] sm:$0xff]  ;;  %v618_v18 = vrot.slane %v3426_v16, %v617_v15  ;;  %v459_v19 = vrot.slane %v3426_v16, %v458_v17  ;;  %v624_v28 = vrot.slane %v3426_v16, %v623_v27  ;;  %s3078_s29 = smov 4   ;;  %s3079_s2 = smov 8  }
  0x91   : > { %2520 = vmatprep.subr.mxu1 %v447_v8  ;;  %2508 = vmatpush3.msra.mxu0 %v444_v9  ;;  %s3080_s30 = smov 12   ;;  %s3081_s8 = smov 20  }
  0x92   : > { %2521 = vmatpush3.msra.mxu1 %v447_v8  ;;  %2509 = vmatprep.subr.mxu0 %v3067_v3  ;;  %s3082_s0 = smov 28   ;;  %s3083_s5 = smov 16  }
  0x93   : > { %2523 = vmatmul.mubr.msk.f32.vlgmr.msra.gmra.mxu1 %vm460_vm1, %v442_v10  ;;  %2510 = vmatpush3.msra.mxu0 %v443_v11  ;;  %s3084_s12 = smov 24  }
  0x94   : > { %2511 = vmatprep.mubr.msk.f32.mxu0 %vm3068_vm2, %v3067_v3  ;;  %2525 = vmatprep.subr.mxu0 %v3067_v3 }
  0x95   : > { %2512 = vmatmul.mubr.msk.f32.vlgmr.msra.gmra.mxu0 %vm460_vm1, %v3409_v12  ;;  %2532 = vmatprep.subr.mxu1 %v3067_v3 }
  0x96   : > { %2529 = vmatprep.mubr.msk.f32.mxu0 %vm3068_vm2, %v3067_v3  ;;  %2536 = vmatprep.mubr.msk.f32.mxu1 %vm3068_vm2, %v3067_v3 }
 0x153   : > { %v3431_v20 = vpop.f32.mrf.mxu1 }
 0x154   : > { %v620_v21 = vadd.f32 %v3431_v20, %v618_v18 }
 0x155   : > { %v530_v22 = vpop.f32.mrf.mxu0  ;;  %v3434_v23 = vpop.f32.mrf.mxu1 }
 0x156   : > { %654 = vrot.lane.b32.xlu1 %v620_v21, %s3069_s10  ;;  %650 = vrot.lane.b32.xlu0 %v620_v21, %s3070_s13  ;;  %v531_v24 = vadd.f32 %v530_v22, %v459_v19  ;;  %v619_v26 = vadd.f32 %v618_v18, %v3434_v23 }
 0x157   : > { %2526 = vmatpush3.xpose.msk.msra.mxu0 %vm706_vm3, %v620_v21  ;;  %v2513_v25 = vpop.f32.mrf.mxu0 }
 0x158   : > { %2527 = vmatprep.subr.mxu0 %v3067_v3 }
 0x15a   : > { %658 = vrot.lane.b32.xlu0 %v620_v21, %s3071_s6  ;;  %632 = vrot.lane.b32.xlu1 %v531_v24, %s3070_s13 }
 0x15b   : > { %2528 = vmatpush3.xpose.msk.msra.mxu0 %vm706_vm3, %v619_v26 }
 0x15c   : > { %2539 = vmatprep.subr.mxu0 %v3067_v3 }
 0x15e   : > { %662 = vrot.lane.b32.xlu0 %v620_v21, %s3072_s21  ;;  %634 = vrot.lane.b32.xlu1 %v531_v24, %s3069_s10 }
 0x15f   : > { %2530 = vmatmul.mubr.msk.f32.vlgmr.msra.gmra.mxu0 %vm706_vm3, %v531_v24 }
 0x160   : > { %2543 = vmatprep.mubr.msk.f32.mxu0 %vm3068_vm2, %v3067_v3 }
 0x162   : > { %648 = vrot.lane.b32.xlu0 %v619_v26, %s3070_s13  ;;  %636 = vrot.lane.b32.xlu1 %v531_v24, %s3071_s6 }
 0x166   : > { %666 = vrot.lane.b32.xlu0 %v620_v21, %s3073_s20  ;;  %652 = vrot.lane.b32.xlu1 %v619_v26, %s3069_s10 }
 0x16a   : > { %656 = vrot.lane.b32.xlu0 %v619_v26, %s3071_s6  ;;  %638 = vrot.lane.b32.xlu1 %v531_v24, %s3072_s21 }
 0x16e   : > { %670 = vrot.lane.b32.xlu0 %v620_v21, %s3074_s18  ;;  %660 = vrot.lane.b32.xlu1 %v619_v26, %s3072_s21 }
 0x172   : > { %664 = vrot.lane.b32.xlu0 %v619_v26, %s3073_s20  ;;  %640 = vrot.lane.b32.xlu1 %v531_v24, %s3073_s20 }
 0x176   : > { %674 = vrot.lane.b32.xlu0 %v620_v21, %s3075_s17  ;;  %668 = vrot.lane.b32.xlu1 %v619_v26, %s3074_s18 }
 0x17a   : > { %672 = vrot.lane.b32.xlu0 %v619_v26, %s3075_s17  ;;  %642 = vrot.lane.b32.xlu1 %v531_v24, %s3074_s18 }
 0x17e   : > { %644 = vrot.lane.b32.xlu0 %v531_v24, %s3075_s17  ;;  %626 = vrot.lane.b32.xlu1 %v624_v28, %s3076_s27 }
 0x1c8   : > { %v655_v29 = vpop.permute.xlu1 %654  ;;  %v651_v30 = vpop.permute.xlu0 %650 }
 0x1c9   : > { %2533 = vmatpush3.xpose.msk.msra.mxu1 %vm706_vm3, %v651_v30  ;;  %2540 = vmatpush3.xpose.msk.msra.mxu0 %vm706_vm3, %v655_v29 }
 0x1ca   : > { %2534 = vmatprep.subr.mxu1 %v3067_v3  ;;  %2541 = vmatprep.subr.mxu0 %v3067_v3 }
 0x1cc   : > { %v659_v31 = vpop.permute.xlu0 %658  ;;  %v633_v32 = vpop.permute.xlu1 %632 }
 0x1d0   : > { %v663_v33 = vpop.permute.xlu0 %662  ;;  %v635_v34 = vpop.permute.xlu1 %634 }
 0x1d4   : > { %v649_v35 = vpop.permute.xlu0 %648  ;;  %v637_v36 = vpop.permute.xlu1 %636 }
 0x1d5   : > { %2535 = vmatpush3.xpose.msk.msra.mxu1 %vm706_vm3, %v649_v35 }
 0x1d6   : > { %2546 = vmatprep.subr.mxu1 %v3067_v3 }
 0x1d8   : > { %v667_v37 = vpop.permute.xlu0 %666  ;;  %2537 = vmatmul.mubr.msk.f32.vlgmr.msra.gmra.mxu1 %vm706_vm3, %v633_v32  ;;  %v653_v38 = vpop.permute.xlu1 %652 }
 0x1d9   : > { %2542 = vmatpush3.xpose.msk.msra.mxu0 %vm706_vm3, %v653_v38  ;;  %2547 = vmatpush3.xpose.msk.msra.mxu1 %vm706_vm3, %v659_v31 }
 0x1da   : > { %2548 = vmatprep.subr.mxu1 %v3067_v3  ;;  %2553 = vmatprep.subr.mxu0 %v3067_v3 }
 0x1db   : > { %2550 = vmatprep.mubr.msk.f32.mxu1 %vm3068_vm2, %v3067_v3 }
 0x1dc   : > { %v657_v39 = vpop.permute.xlu0 %656  ;;  %v639_v40 = vpop.permute.xlu1 %638  ;;  %2544 = vmatmul.mubr.msk.f32.vlgmr.msra.gmra.mxu0 %vm706_vm3, %v635_v34 }
 0x1dd   : > { %2549 = vmatpush3.xpose.msk.msra.mxu1 %vm706_vm3, %v657_v39  ;;  %2554 = vmatpush3.xpose.msk.msra.mxu0 %vm706_vm3, %v663_v33 }
 0x1de   : > { %2560 = vmatprep.subr.mxu1 %v3067_v3  ;;  %2555 = vmatprep.subr.mxu0 %v3067_v3 }
 0x1df   : > { %2557 = vmatprep.mubr.msk.f32.mxu0 %vm3068_vm2, %v3067_v3 }
 0x1e0   : > { %v671_v41 = vpop.permute.xlu0 %670  ;;  %2551 = vmatmul.mubr.msk.f32.vlgmr.msra.gmra.mxu1 %vm706_vm3, %v637_v36  ;;  %v661_v42 = vpop.permute.xlu1 %660 }
 0x1e1   : > { %2556 = vmatpush3.xpose.msk.msra.mxu0 %vm706_vm3, %v661_v42  ;;  %2561 = vmatpush3.xpose.msk.msra.mxu1 %vm706_vm3, %v667_v37 }
 0x1e2   : > { %2562 = vmatprep.subr.mxu1 %v3067_v3  ;;  %2567 = vmatprep.subr.mxu0 %v3067_v3 }
 0x1e3   : > { %2564 = vmatprep.mubr.msk.f32.mxu1 %vm3068_vm2, %v3067_v3 }
 0x1e4   : > { %v665_v43 = vpop.permute.xlu0 %664  ;;  %v641_v44 = vpop.permute.xlu1 %640  ;;  %2558 = vmatmul.mubr.msk.f32.vlgmr.msra.gmra.mxu0 %vm706_vm3, %v639_v40 }
 0x1e5   : > { %2563 = vmatpush3.xpose.msk.msra.mxu1 %vm706_vm3, %v665_v43  ;;  %2568 = vmatpush3.xpose.msk.msra.mxu0 %vm706_vm3, %v671_v41 }
 0x1e6   : > { %2574 = vmatprep.subr.mxu1 %v3067_v3  ;;  %2569 = vmatprep.subr.mxu0 %v3067_v3 }
 0x1e7   : > { %2571 = vmatprep.mubr.msk.f32.mxu0 %vm3068_vm2, %v3067_v3 }
 0x1e8   : > { %v675_v45 = vpop.permute.xlu0 %674  ;;  %2565 = vmatmul.mubr.msk.f32.vlgmr.msra.gmra.mxu1 %vm706_vm3, %v641_v44  ;;  %v669_v46 = vpop.permute.xlu1 %668 }
 0x1e9   : > { %2570 = vmatpush3.xpose.msk.msra.mxu0 %vm706_vm3, %v669_v46  ;;  %2575 = vmatpush3.xpose.msk.msra.mxu1 %vm706_vm3, %v675_v45 }
 0x1ea   : > { %2576 = vmatprep.subr.mxu1 %v3067_v3  ;;  %2578 = vmatprep.mubr.msk.f32.mxu1 %vm3068_vm2, %v3067_v3 }
 0x1eb   : > { %2595 = vmatprep.subr.mxu0 %v3067_v3 }
 0x1ec   : > { %v673_v47 = vpop.permute.xlu0 %672  ;;  %v643_v48 = vpop.permute.xlu1 %642 }
 0x1ed   : > { %2572 = vmatmul.mubr.msk.f32.vlgmr.msra.gmra.mxu0 %vm706_vm3, %v643_v48  ;;  %2577 = vmatpush3.xpose.msk.msra.mxu1 %vm706_vm3, %v673_v47 }
 0x1ee   : > { %2581 = vmatprep.subr.mxu1 %v3067_v3  ;;  %2599 = vmatprep.mubr.msk.f32.mxu0 %vm3068_vm2, %v3067_v3 }
 0x1f0   : > { %v645_v49 = vpop.permute.xlu0 %644  ;;  %v627_v50 = vpop.permute.xlu1 %626 }
 0x1f1   : > { %v630_v51 = vadd.f32 %v3431_v20, %v627_v50  ;;  %2579 = vmatmul.mubr.msk.f32.vlgmr.msra.gmra.mxu1 %vm706_vm3, %v645_v49  ;;  %v629_v52 = vadd.f32 %v627_v50, %v3434_v23 }
 0x1f2   : > { %2585 = vmatprep.mubr.msk.f32.mxu1 %vm3068_vm2, %v3067_v3 }
 0x1f3   : > { %692 = vrot.lane.b32.xlu0 %v630_v51, %s3072_s21  ;;  %680 = vrot.lane.b32.xlu1 %v630_v51, %s3070_s13 }
 0x1f7   : > { %700 = vrot.lane.b32.xlu0 %v630_v51, %s3074_s18  ;;  %684 = vrot.lane.b32.xlu1 %v630_v51, %s3069_s10 }
 0x1fb   : > { %688 = vrot.lane.b32.xlu1 %v630_v51, %s3071_s6  ;;  %678 = vrot.lane.b32.xlu0 %v629_v52, %s3070_s13 }
 0x1ff   : > { %696 = vrot.lane.b32.xlu1 %v630_v51, %s3073_s20  ;;  %682 = vrot.lane.b32.xlu0 %v629_v52, %s3069_s10 }
 0x203   : > { %704 = vrot.lane.b32.xlu1 %v630_v51, %s3075_s17  ;;  %690 = vrot.lane.b32.xlu0 %v629_v52, %s3072_s21 }
 0x207   : > { %1406 = vrot.lane.b32.xlu1 %v630_v51, %s3077_s28  ;;  %698 = vrot.lane.b32.xlu0 %v629_v52, %s3074_s18 }
 0x20b   : > { %686 = vrot.lane.b32.xlu1 %v629_v52, %s3071_s6  ;;  %1404 = vrot.lane.b32.xlu0 %v629_v52, %s3077_s28 }
 0x20f   : > { %694 = vrot.lane.b32.xlu1 %v629_v52, %s3073_s20 }
 0x213   : > { %702 = vrot.lane.b32.xlu1 %v629_v52, %s3075_s17 }
 0x21f   : > { %v779_v53 = vpop.f32.mrf.mxu0 }
 0x220   : > { %v1316_v55 = vsel %vm1315_vm4, %v779_v53, -inf }
 0x221   : > { %v2531_v54 = vpop.f32.mrf.mxu0 }
 0x22a   : > { %1317 = vmax.xlane.f32.xlu0 %v1316_v55 }
 0x265   : > { %v693_v56 = vpop.permute.xlu0 %692  ;;  %v681_v57 = vpop.permute.xlu1 %680 }
 0x269   : > { %v701_v58 = vpop.permute.xlu0 %700  ;;  %v685_v59 = vpop.permute.xlu1 %684 }
 0x26d   : > { %v689_v60 = vpop.permute.xlu1 %688  ;;  %v679_v61 = vpop.permute.xlu0 %678 }
 0x271   : > { %v697_v62 = vpop.permute.xlu1 %696  ;;  %v683_v63 = vpop.permute.xlu0 %682 }
 0x275   : > { %v705_v0 = vpop.permute.xlu1 %704  ;;  %v691_v1 = vpop.permute.xlu0 %690 }
 0x279   : > { %v1407_v2 = vpop.permute.xlu1 %1406  ;;  %v3535_v4 = vpop.permute.xlu0 %698 }
 0x27a   : > { %2582 = vmatpush3.msra.mxu1 %v1407_v2 }
 0x27b   : > { %2583 = vmatprep.subr.mxu1 %v3067_v3 }
 0x27d   : > { %v1405_v5 = vpop.permute.xlu0 %1404  ;;  %v687_v33 = vpop.permute.xlu1 %686 }
 0x27e   : > { %2584 = vmatpush3.msra.mxu1 %v1405_v5 }
 0x27f   : > { %2588 = vmatprep.subr.mxu1 %v3067_v3 }
 0x281   : > { %v695_v34 = vpop.permute.xlu1 %694 }
 0x285   : > { %v703_v37 = vpop.permute.xlu1 %702 }
 0x298   : > { %v855_v6 = vpop.f32.mrf.mxu1 }
 0x299   : > { %v1319_v7 = vsel %vm1315_vm4, %v855_v6, -inf }
 0x29a   : > { %v2538_v8 = vpop.f32.mrf.mxu1  ;;  %1320 = vmax.xlane.f32.xlu1 %v1319_v7 }
 0x29c   : > { %v931_v9 = vpop.f32.mrf.mxu0 }
 0x29d   : > { %v1322_v10 = vsel %vm1315_vm4, %v931_v9, -inf }
 0x29e   : > { %1323 = vmax.xlane.f32.xlu0 %v1322_v10  ;;  %v2545_v11 = vpop.f32.mrf.mxu0 }
 0x2a0   : > { %v1007_v13 = vpop.f32.mrf.mxu1 }
 0x2a1   : > { %v1325_v15 = vsel %vm1315_vm4, %v1007_v13, -inf }
 0x2a2   : > { %v2552_v17 = vpop.f32.mrf.mxu1  ;;  %1326 = vmax.xlane.f32.xlu0 %v1325_v15 }
 0x2a4   : > { %v3542_v18 = vpop.f32.mrf.mxu0 }
 0x2a5   : > { %v1328_v28 = vsel %vm1315_vm4, %v3542_v18, -inf }
 0x2a6   : > { %v2559_v19 = vpop.f32.mrf.mxu0 }
 0x2a8   : > { %v1159_v20 = vpop.f32.mrf.mxu1 }
 0x2a9   : > { %v1331_v21 = vsel %vm1315_vm4, %v1159_v20, -inf }
 0x2aa   : > { %v2566_v22 = vpop.f32.mrf.mxu1  ;;  %1332 = vmax.xlane.f32.xlu0 %v1331_v21 }
 0x2ab   : > { %1485 = vrot.lane.b32.xlu1 %v681_v57, %s3077_s28 }
 0x2ad   : > { %v3546_v23 = vpop.f32.mrf.mxu0 }
 0x2ae   : > { %v1334_v29 = vsel %vm1315_vm4, %v3546_v23, -inf }
 0x2af   : > { %v2573_v24 = vpop.f32.mrf.mxu0 }
 0x2b1   : > { %v1311_v25 = vpop.f32.mrf.mxu1 }
 0x2b2   : > { %v1337_v26 = vsel %vm1315_vm4, %v1311_v25, -inf }
 0x2b3   : > { %v2580_v27 = vpop.f32.mrf.mxu1  ;;  %1338 = vmax.xlane.f32.xlu0 %v1337_v26  ;;  %v1318_v30 = vpop.xlane.xlu0 %1317 }
 0x2b4   : > { %v1340_v31 = vsub.f32 %v779_v53, %v1318_v30 }
 0x2b6   : > { %v1348_v32 = vmul.f32 1.442695, %v1340_v31 }
 0x2b8   : > { %2785 = vpow2.f32 %v1348_v32 }
 0x2c5   : > { %v3562_v35 = vpop.eup %2785 }
 0x2c6   : > { %v1364_v36 = vsel %vm1315_vm4, %v3562_v35, 0.0 }
 0x2c9   : > { %1564 = vrot.lane.b32.xlu0 %v685_v59, %s3077_s28 }
 0x2cd   : > { %1562 = vrot.lane.b32.xlu0 %v683_v63, %s3077_s28 }
 0x2cf   : > { %1329 = vmax.xlane.f32.xlu1 %v1328_v28 }
 0x2d1   : > { %1722 = vrot.lane.b32.xlu0 %v693_v56, %s3077_s28 }
 0x2d3   : > { %1335 = vmax.xlane.f32.xlu1 %v1334_v29 }
 0x2d5   : > { %1720 = vrot.lane.b32.xlu0 %v691_v1, %s3077_s28 }
 0x2d9   : > { %1880 = vrot.lane.b32.xlu0 %v701_v58, %s3077_s28 }
 0x2e4   : > { %1483 = vrot.lane.b32.xlu1 %v679_v61, %s3077_s28 }
 0x2e8   : > { %1643 = vrot.lane.b32.xlu1 %v689_v60, %s3077_s28 }
 0x2ec   : > { %1641 = vrot.lane.b32.xlu1 %v687_v33, %s3077_s28 }
 0x2f0   : > { %1801 = vrot.lane.b32.xlu1 %v697_v62, %s3077_s28 }
 0x2f4   : > { %1799 = vrot.lane.b32.xlu1 %v695_v34, %s3077_s28 }
 0x2f8   : > { %1365 = vadd.xlane.f32.xlu0 %v1364_v36  ;;  %1959 = vrot.lane.b32.xlu1 %v705_v0, %s3077_s28 }
 0x323   : > { %v1321_v38 = vpop.xlane.xlu1 %1320 }
 0x324   : > { %v1341_v39 = vsub.f32 %v855_v6, %v1321_v38 }
 0x326   : > { %v1350_v40 = vmul.f32 1.442695, %v1341_v39 }
 0x327   : > { %v1324_v41 = vpop.xlane.xlu0 %1323  ;;  %v1486_v1 = vpop.permute.xlu1 %1485 }
 0x328   : > { %2787 = vpow2.f32 %v1350_v40  ;;  %v1342_v42 = vsub.f32 %v931_v9, %v1324_v41 }
 0x32a   : > { %v1352_v43 = vmul.f32 1.442695, %v1342_v42 }
 0x32b   : > { %v1327_v44 = vpop.xlane.xlu0 %1326 }
 0x32c   : > { %2789 = vpow2.f32 %v1352_v43  ;;  %v1343_v45 = vsub.f32 %v1007_v13, %v1327_v44 }
 0x32e   : > { %v1354_v46 = vmul.f32 1.442695, %v1343_v45 }
 0x330   : > { %2791 = vpow2.f32 %v1354_v46 }
 0x333   : > { %v1333_v47 = vpop.xlane.xlu0 %1332 }
 0x334   : > { %v1345_v48 = vsub.f32 %v1159_v20, %v1333_v47 }
 0x335   : > { %v3568_v49 = vpop.eup %2787 }
 0x336   : > { %v1358_v50 = vmul.f32 1.442695, %v1345_v48  ;;  %v1367_v51 = vsel %vm1315_vm4, %v3568_v49, 0.0 }
 0x337   : > { %1368 = vadd.xlane.f32.xlu1 %v1367_v51 }
 0x338   : > { %2793 = vpow2.f32 %v1358_v50 }
 0x339   : > { %v3572_v52 = vpop.eup %2789 }
 0x33a   : > { %v1370_v53 = vsel %vm1315_vm4, %v3572_v52, 0.0 }
 0x33b   : > { %1371 = vadd.xlane.f32.xlu0 %v1370_v53 }
 0x33c   : > { %v1339_v54 = vpop.xlane.xlu0 %1338 }
 0x33d   : > { %v3576_v55 = vpop.eup %2791  ;;  %v1347_v56 = vsub.f32 %v1311_v25, %v1339_v54 }
 0x33e   : > { %v1373_v57 = vsel %vm1315_vm4, %v3576_v55, 0.0 }
 0x33f   : > { %v1362_v58 = vmul.f32 1.442695, %v1347_v56  ;;  %1374 = vadd.xlane.f32.xlu0 %v1373_v57 }
 0x340   : > { %v1565_v59 = vpop.permute.xlu0 %1564 }
 0x341   : > { %2795 = vpow2.f32 %v1362_v58  ;;  %2596 = vmatpush3.msra.mxu0 %v1565_v59 }
 0x342   : > { %2597 = vmatprep.subr.mxu0 %v3067_v3 }
 0x344   : > { %v1563_v60 = vpop.permute.xlu0 %1562 }
 0x345   : > { %v3581_v61 = vpop.eup %2793  ;;  %2598 = vmatpush3.msra.mxu0 %v1563_v60 }
 0x346   : > { %v1379_v62 = vsel %vm1315_vm4, %v3581_v61, 0.0  ;;  %2609 = vmatprep.subr.mxu0 %v3067_v3 }
 0x347   : > { %1380 = vadd.xlane.f32.xlu0 %v1379_v62  ;;  %v453_v62 = vld [vmem:[%s3372_s9 + $0x10] sm:$0xff] }
 0x348   : > { %v1723_v17 = vpop.permute.xlu0 %1722 }
 0x34e   : > { %v3586_v63 = vpop.eup %2795 }
 0x34f   : > { %v1385_v0 = vsel %vm1315_vm4, %v3586_v63, 0.0 }
 0x350   : > { %1386 = vadd.xlane.f32.xlu0 %v1385_v0 }
 0x358   : > { %v1330_v2 = vpop.xlane.xlu1 %1329 }
 0x359   : > { %v1344_v5 = vsub.f32 %v3542_v18, %v1330_v2  ;;  %v1721_v18 = vpop.permute.xlu0 %1720 }
 0x35b   : > { %v1356_v6 = vmul.f32 1.442695, %v1344_v5 }
 0x35c   : > { %v1336_v7 = vpop.xlane.xlu1 %1335 }
 0x35d   : > { %2797 = vpow2.f32 %v1356_v6  ;;  %v1346_v8 = vsub.f32 %v3546_v23, %v1336_v7  ;;  %v3602_v19 = vpop.permute.xlu0 %1880 }
 0x35f   : > { %v1360_v9 = vmul.f32 1.442695, %v1346_v8 }
 0x360   : > { %v1484_v22 = vpop.permute.xlu1 %1483 }
 0x361   : > { %2799 = vpow2.f32 %v1360_v9 }
 0x364   : > { %v1644_v23 = vpop.permute.xlu1 %1643 }
 0x366   : > { %1878 = vrot.lane.b32.xlu0 %v3535_v4, %s3077_s28 }
 0x368   : > { %v1642_v24 = vpop.permute.xlu1 %1641 }
 0x36a   : > { %v3594_v10 = vpop.eup %2797 }
 0x36b   : > { %v1376_v11 = vsel %vm1315_vm4, %v3594_v10, 0.0 }
 0x36c   : > { %1377 = vadd.xlane.f32.xlu1 %v1376_v11  ;;  %v1802_v25 = vpop.permute.xlu1 %1801 }
 0x36e   : > { %v3598_v13 = vpop.eup %2799 }
 0x36f   : > { %v1382_v15 = vsel %vm1315_vm4, %v3598_v13, 0.0 }
 0x370   : > { %1383 = vadd.xlane.f32.xlu1 %v1382_v15  ;;  %v1800_v26 = vpop.permute.xlu1 %1799 }
 0x374   : > { %v1960_v27 = vpop.permute.xlu1 %1959 }
 0x381   : > { %v1366_v20 = vpop.xlane.xlu0 %1365  ;;  %1957 = vrot.lane.b32.xlu1 %v703_v37, %s3077_s28 }
 0x382   : > { %2801 = vrcp.f32 %v1366_v20 }
 0x38f   : > { %v2802_v4 = vpop.eup %2801 }
 0x390   : > { %v1389_v21 = vmul.f32 %v2802_v4, %v3562_v35 }
 0x392   : > { %2586 = vmatmul.mubr.msk.f32.vlgmr.msra.gmra.mxu1 %vm1315_vm4, %v1389_v21 }
 0x393   : > { %2589 = vmatpush3.msra.mxu1 %v1486_v1  ;;  %2592 = vmatprep.mubr.msk.f32.mxu1 %vm3068_vm2, %v3067_v3  ;;  %v451_v1 = vld [vmem:[%s3372_s9] sm:$0xff] }
 0x394   : > { %2590 = vmatprep.subr.mxu1 %v3067_v3 }
 0x395   : > { %2591 = vmatpush3.msra.mxu1 %v1484_v22 }
 0x396   : > { %2602 = vmatprep.subr.mxu1 %v3067_v3 }
 0x3c0   : > { %v1369_v28 = vpop.xlane.xlu1 %1368 }
 0x3c1   : > { %2803 = vrcp.f32 %v1369_v28 }
 0x3c4   : > { %v1372_v29 = vpop.xlane.xlu0 %1371 }
 0x3c5   : > { %2805 = vrcp.f32 %v1372_v29 }
 0x3c8   : > { %v1375_v30 = vpop.xlane.xlu0 %1374 }
 0x3c9   : > { %2807 = vrcp.f32 %v1375_v30 }
 0x3ce   : > { %v2804_v31 = vpop.eup %2803 }
 0x3cf   : > { %v1391_v32 = vmul.f32 %v2804_v31, %v3568_v49 }
 0x3d0   : > { %v1381_v33 = vpop.xlane.xlu0 %1380 }
 0x3d1   : > { %2809 = vrcp.f32 %v1381_v33  ;;  %2593 = vmatmul.mubr.msk.f32.vlgmr.msra.gmra.mxu1 %vm1315_vm4, %v1391_v32 }
 0x3d2   : > { %v2806_v34 = vpop.eup %2805  ;;  %2603 = vmatpush3.msra.mxu1 %v1644_v23  ;;  %2606 = vmatprep.mubr.msk.f32.mxu1 %vm3068_vm2, %v3067_v3 }
 0x3d3   : > { %2604 = vmatprep.subr.mxu1 %v3067_v3  ;;  %v1393_v35 = vmul.f32 %v2806_v34, %v3572_v52 }
 0x3d4   : > { %2605 = vmatpush3.msra.mxu1 %v1642_v24  ;;  %v2078_v24 = vsub.s32 3, %v3422_v14 }
 0x3d5   : > { %2600 = vmatmul.mubr.msk.f32.vlgmr.msra.gmra.mxu0 %vm1315_vm4, %v1393_v35  ;;  %2616 = vmatprep.subr.mxu1 %v3067_v3 }
 0x3d6   : > { %v2808_v36 = vpop.eup %2807  ;;  %2610 = vmatpush3.msra.mxu0 %v1723_v17  ;;  %2613 = vmatprep.mubr.msk.f32.mxu0 %vm3068_vm2, %v3067_v3 }
 0x3d7   : > { %2611 = vmatprep.subr.mxu0 %v3067_v3  ;;  %v1395_v37 = vmul.f32 %v2808_v36, %v3576_v55 }
 0x3d8   : > { %2612 = vmatpush3.msra.mxu0 %v1721_v18 }
 0x3d9   : > { %2607 = vmatmul.mubr.msk.f32.vlgmr.msra.gmra.mxu1 %vm1315_vm4, %v1395_v37  ;;  %2623 = vmatprep.subr.mxu0 %v3067_v3  ;;  %v1387_v40 = vpop.xlane.xlu0 %1386 }
 0x3da   : > { %2617 = vmatpush3.msra.mxu1 %v1802_v25  ;;  %2620 = vmatprep.mubr.msk.f32.mxu1 %vm3068_vm2, %v3067_v3  ;;  %2811 = vrcp.f32 %v1387_v40  ;;  %v2079_v25 = vrot.slane %v3426_v16, %v2078_v24  ;;  %v2175_v40 = vsub.s32 5, %v3422_v14 }
 0x3db   : > { %2618 = vmatprep.subr.mxu1 %v3067_v3 }
 0x3dc   : > { %2619 = vmatpush3.msra.mxu1 %v1800_v26 }
 0x3dd   : > { %2630 = vmatprep.subr.mxu1 %v3067_v3  ;;  %v1879_v49 = vpop.permute.xlu0 %1878 }
 0x3de   : > { %v2810_v38 = vpop.eup %2809 }
 0x3df   : > { %v1399_v39 = vmul.f32 %v2810_v38, %v3581_v61  ;;  %v454_v61 = vld [vmem:[%s3372_s9 + $0x18] sm:$0xff] }
 0x3e1   : > { %2621 = vmatmul.mubr.msk.f32.vlgmr.msra.gmra.mxu1 %vm1315_vm4, %v1399_v39  ;;  %v2170_v39 = vsub.s32 4, %v3422_v14 }
 0x3e2   : > { %2631 = vmatpush3.msra.mxu1 %v1960_v27  ;;  %2634 = vmatprep.mubr.msk.f32.mxu1 %vm3068_vm2, %v3067_v3 }
 0x3e3   : > { %2632 = vmatprep.subr.mxu1 %v3067_v3 }
 0x3e7   : > { %v2812_v43 = vpop.eup %2811 }
 0x3e8   : > { %v1403_v45 = vmul.f32 %v2812_v43, %v3586_v63  ;;  %v452_v63 = vld [vmem:[%s3372_s9 + $0x8] sm:$0xff]  ;;  %s3786_s9 = sld [smem:[#allocation17_spill]] }
 0x3ee   : > { %p2430_p2 = scmp.ne.s32.totalorder %s3786_s9, 1 }
 0x3f5   : > { %v1378_v41 = vpop.xlane.xlu1 %1377 }
 0x3f6   : > { %2813 = vrcp.f32 %v1378_v41 }
 0x3f9   : > { %v1384_v42 = vpop.xlane.xlu1 %1383 }
 0x3fa   : > { %2815 = vrcp.f32 %v1384_v42  ;;  %v2176_v42 = vrot.slane %v3426_v16, %v2175_v40 }
 0x3fd   : > { %v1958_v44 = vpop.permute.xlu1 %1957 }
 0x3fe   : > { %2633 = vmatpush3.msra.mxu1 %v1958_v44 }
 0x3ff   : > { %2635 = vmatmul.mubr.msk.f32.vlgmr.msra.gmra.mxu1 %vm1315_vm4, %v1403_v45 }
 0x403   : > { %v2814_v46 = vpop.eup %2813 }
 0x404   : > { %v1397_v47 = vmul.f32 %v2814_v46, %v3594_v10 }
 0x406   : > { %2614 = vmatmul.mubr.msk.f32.vlgmr.msra.gmra.mxu0 %vm1315_vm4, %v1397_v47 }
 0x407   : > { %v2816_v48 = vpop.eup %2815  ;;  %2624 = vmatpush3.msra.mxu0 %v3602_v19  ;;  %2627 = vmatprep.mubr.msk.f32.mxu0 %vm3068_vm2, %v3067_v3 }
 0x408   : > { %2625 = vmatprep.subr.mxu0 %v3067_v3  ;;  %v1401_v50 = vmul.f32 %v2816_v48, %v3598_v13 }
 0x409   : > { %2626 = vmatpush3.msra.mxu0 %v1879_v49 }
 0x40a   : > { %2628 = vmatmul.mubr.msk.f32.vlgmr.msra.gmra.mxu0 %vm1315_vm4, %v1401_v50  ;;  %2637 = vmatprep.subr.mxu0 %v3067_v3 }
 0x40b   : > { %2645 = vmatprep.mubr.msk.f32.mxu0 %vm3068_vm2, %v3067_v3  ;;  %2638 = vmatpush3.msra.mxu0 %v454_v61 }
 0x40c   : > { %2639 = vmatprep.subr.mxu0 %v3067_v3 }
 0x40d   : > { %2640 = vmatpush3.msra.mxu0 %v453_v62 }
 0x40e   : > { %2641 = vmatprep.subr.mxu0 %v3067_v3 }
 0x40f   : > { %2642 = vmatpush3.msra.mxu0 %v452_v63 }
 0x410   : > { %2643 = vmatprep.subr.mxu0 %v3067_v3 }
 0x411   : > { %2644 = vmatpush3.msra.mxu0 %v451_v1 }
 0x452   : > { %v1479_v51 = vpop.f32.mrf.mxu1 }
 0x454   : > { %v2587_v52 = vpop.f32.mrf.mxu1 }
 0x491   : > { %v1558_v53 = vpop.f32.mrf.mxu1 }
 0x492   : > { %2037 = vrot.lane.b32.xlu0 %v1558_v53, %s3078_s29 }
 0x493   : > { %v2594_v54 = vpop.f32.mrf.mxu1 }
 0x495   : > { %v1637_v55 = vpop.f32.mrf.mxu0 }
 0x496   : > { %2041 = vrot.lane.b32.xlu1 %v1637_v55, %s3079_s2 }
 0x497   : > { %v2601_v56 = vpop.f32.mrf.mxu0 }
 0x499   : > { %v1716_v57 = vpop.f32.mrf.mxu1 }
 0x49a   : > { %2045 = vrot.lane.b32.xlu0 %v1716_v57, %s3080_s30 }
 0x49b   : > { %v2608_v58 = vpop.f32.mrf.mxu1 }
 0x4a1   : > { %v1874_v59 = vpop.f32.mrf.mxu1 }
 0x4a2   : > { %2053 = vrot.lane.b32.xlu0 %v1874_v59, %s3081_s8 }
 0x4a3   : > { %v2622_v60 = vpop.f32.mrf.mxu1 }
 0x4bf   : > { %v2032_v0 = vpop.f32.mrf.mxu1 }
 0x4c0   : > { %2061 = vrot.lane.b32.xlu0 %v2032_v0, %s3082_s0 }
 0x4c1   : > { %v2636_v2 = vpop.f32.mrf.mxu1 }
 0x4c6   : > { %v1795_v5 = vpop.f32.mrf.mxu0 }
 0x4c7   : > { %2049 = vrot.lane.b32.xlu1 %v1795_v5, %s3083_s5 }
 0x4c8   : > { %v2615_v6 = vpop.f32.mrf.mxu0 }
 0x4ca   : > { %v1953_v7 = vpop.f32.mrf.mxu0 }
 0x4cb   : > { %2057 = vrot.lane.b32.xlu1 %v1953_v7, %s3084_s12 }
 0x4cc   : > { %v2629_v8 = vpop.f32.mrf.mxu0 }
 0x504   : > { %v2038_v9 = vpop.permute.xlu0 %2037 }
 0x505   : > { %v2064_v3 = vsel %vm706_vm3, %v1479_v51, %v2038_v9 }
 0x508   : > { %v2042_v10 = vpop.permute.xlu1 %2041 }
 0x509   : > { %v2066_v13 = vsel %vm2065_vm5, %v2064_v3, %v2042_v10 }
 0x50c   : > { %v2046_v11 = vpop.permute.xlu0 %2045 }
 0x50d   : > { %v2068_v15 = vsel %vm2067_vm6, %v2066_v13, %v2046_v11 }
 0x514   : > { %v2054_v18 = vpop.permute.xlu0 %2053 }
 0x532   : > { %v2062_v21 = vpop.permute.xlu0 %2061 }
 0x539   : > { %v2050_v17 = vpop.permute.xlu1 %2049 }
 0x53a   : > { %v2069_v19 = vsel %vm1315_vm4, %v2068_v15, %v2050_v17 }
 0x53b   : > { %v2071_v20 = vsel %vm2070_vm7, %v2069_v19, %v2054_v18 }
 0x53d   : > { %v2058_v4 = vpop.permute.xlu1 %2057 }
 0x53e   : > { %v2073_v22 = vsel %vm2072_vm8, %v2071_v20, %v2058_v4 }
 0x53f   : > { %v2075_v23 = vsel %vm2074_vm9, %v2073_v22, %v2062_v21 }
 0x540   : > { %2646 = vmatmul.mubr.msk.f32.vlgmr.msra.gmra.mxu0 %vm460_vm1, %v2075_v23 }
 0x600   : > { %v2149_v26 = vpop.f32.mrf.mxu0 }
 0x601   : > { %v2150_v27 = vadd.f32 %v2149_v26, %v2079_v25 }
 0x602   : > { %v2647_v28 = vpop.f32.mrf.mxu0 }
 0x603   : > { %v2153_v29 = vadd.f32 %v2150_v27, %v3409_v12  ;;  %v2171_v12 = vrot.slane %v3426_v16, %v2170_v39 }
 0x605   : > { %v2154_v30 = vsel %vm460_vm1, %v2153_v29, 0.0 }
 0x606   : > { %2155 = vadd.xlane.f32.xlu1 %v2154_v30 }
 0x68f   : > { %v2156_v31 = vpop.xlane.xlu1 %2155 }
 0x690   : > { %v2158_v32 = vmul.f32 0.03125, %v2156_v31 }
 0x692   : > { %v2159_v33 = vsub.f32 %v2153_v29, %v2158_v32 }
 0x694   : > { %v2160_v34 = vmul.f32 %v2159_v33, %v2159_v33 }
 0x696   : > { %v2161_v35 = vsel %vm460_vm1, %v2160_v34, 0.0 }
 0x697   : > { %2162 = vadd.xlane.f32.xlu0 %v2161_v35 }
 0x720   : > { %v2163_v36 = vpop.xlane.xlu0 %2162 }
 0x721   : > { %v2164_v37 = vmul.f32 0.03125, %v2163_v36 }
 0x723   : > { %v2165_v38 = vadd.f32 1e-05, %v2164_v37 }
 0x725   : > { %2817 = vrsqrt.f32 %v2165_v38 }
 0x732   : > { %v2818_v41 = vpop.eup %2817 }
 0x733   : > { %v2167_v43 = vmul.f32 %v2818_v41, %v2159_v33 }
 0x735   : > { %v2172_v44 = vmul.f32 %v2171_v12, %v2167_v43  ;;  %2182 = sbr.rel (%p2430_p2) target bundleno = 1851 (0x73b), region = 68 }
 0x737   : > { %v2177_v45 = vadd.f32 %v2176_v42, %v2172_v44 }
 0x739   : > { %2178 = vst.msk [vmem:[#allocation2] sm:$0xff] %vm460_vm1, %v2177_v45 }
 0x73a   : > { %2183 = vst.msk [vmem:[%s3391_s14] sm:$0xff] %vm460_vm1, %v2177_v45 }
 0x73b PF: > { %s3787_s15 = sld [smem:[#allocation18_spill]]  ;;  %s2198_s21 = sshll.u32 %s3391_s14, 4  ;;  %s2199_s21 = int_to_ptr.vmem [resolvable:$true] %s2198_s21 }
 0x73c   : > { %s3788_s16 = sld [smem:[#allocation24_spill]]  ;;  %s2185_s20 = scalar_lea.sflag [#allocation5], %s3352_s26 }
 0x73d   : > { %s3789_s13 = sld [smem:[#allocation30_spill]]  ;;  %s2931_s18 = scalar_lea.vmem %s2199_s21, 128 }
 0x73e   : > { %p2932_p9 = scmp.ne.s32.totalorder %s2199_s21, %s2931_s18  ;;  %s3085_s17 = smov [#allocation11]  }
 0x73f   : > { %s2935_s27 = sshll.u32 %s3085_s17, 4  ;;  %s2936_s27 = int_to_ptr.vmem [resolvable:$false] %s2935_s27 }
 0x740   : > { %s2937_s28 = scalar_lea.vmem %s2936_s27, 256  ;;  %p2938_p3 = scmp.lt.s32.totalorder %s2199_s21, %s2936_s27 }
 0x741   : > { %s2432_s19 = sshll.u32 %s3787_s15, 7  ;;  %p2939_p8 = scmp.lt.s32.totalorder %s2937_s28, %s2931_s18 }
 0x742   : > { %p3790_p6 = scmp.ne.s32.totalorder %s3788_s16, 0 }
 0x743   : > { %s2196_s6 = scalar_lea.hbm %s3789_s13, %s2432_s19  ;;  %p2940_p13 = por %p2939_p8, %p2938_p3 }
 0x744   : > { %p2933_p12 = pnand %p2932_p9, %p3790_p6 }
 0x746   : > { %p2934_p11 = pneg %p2933_p12 }
 0x748   : > { %p2941_p0 = pnand %p2940_p13, %p2934_p11 }
 0x74a   : > { %2944 = shalt.err (!%p2941_p0)
}
 0x74b   : > { %s2945_s29 = scalar_lea.hbm %s2196_s6, 128  ;;  %s2949_s2 = scalar_lea.hbm %s3789_s13, 256 }
 0x74c   : > { %p2946_p10 = scmp.ne.s32.totalorder %s2196_s6, %s2945_s29  ;;  %p2950_p5 = scmp.lt.s32.totalorder %s2196_s6, %s3789_s13 }
 0x74d   : > { %p2951_p1 = scmp.lt.s32.totalorder %s2949_s2, %s2945_s29 }
 0x74e   : > { %p2947_p4 = pnand %p2946_p10, %p3790_p6 }
 0x74f   : > { %p2952_p2 = por %p2951_p1, %p2950_p5 }
 0x750   : > { %p2948_p7 = pneg %p2947_p4 }
 0x752   : > { %p2953_p9 = pnand %p2952_p2, %p2948_p7 }
 0x754   : > { %2956 = shalt.err (!%p2953_p9)
}
 0x755   : > { %2656 = dma.vmem_to_hbm [thread:$0]  (%p3790_p6), %s2199_s21, 128, %s2196_s6, %s2185_s20  }
 0x756 PF: > { %s3791_s0 = sld [smem:[#allocation26_spill]]  ;;  %p2676_p12 = scmp.ge.s32.totalorder %s3059_s7, 2 }
 0x757   : > { %s2210_s5 = sand.u32 1, %s3031_s24  }
 0x758   : > { %s2211_s12 = scalar_lea.sflag [#allocation5], %s2210_s5 }
 0x75c   : > { %p3792_p11 = scmp.ne.s32.totalorder %s3791_s0, 0 }
 0x75e   : > { %p2672_p3 = pnand %p2676_p12, %p3792_p11 }
 0x760   : > { %p2673_p8 = pneg %p2672_p3 }
 0x762   : > { %3014 = dma.done.wait (%p2673_p8), %s2211_s12, 128  }
 0x763   : > { %3016 = vsyncadd (%p2673_p8), %s2211_s12, 4294967168  ;;  %s28_s7 = sadd.s32 1, %s3059_s7   ;;  %s3793_s9 = sld [smem:[#allocation22_spill]] }
 0x764   : > { %p25_p13 = scmp.ge.s32.totalorder %s28_s7, 6   ;;  %s3794_s15 = sld [smem:[#allocation16_spill]] }
 0x765   : > { %s3795_s26 = sld [smem:[#allocation25_spill]]  ;;  %s3800_s21 = smov %s3023_s22 }
 0x766   : > { %s3796_s27 = sld [smem:[#allocation19_spill]]  ;;  %s3801_s22 = smov %s3027_s23 }
 0x767   : > { %s3797_s28 = sld [smem:[#allocation20_spill]]  ;;  %s3803_s24 = smov %s3035_s25 }
 0x768   : > { %s3798_s29 = sld [smem:[#allocation21_spill]]  ;;  %27 = sbr.rel (!%p25_p13) target bundleno = 18 (0x12), region = 140 }
 0x769   : > { %s3799_s30 = sld [smem:[#allocation23_spill]]  ;;  %s3802_s23 = smov %s3793_s9 }
 0x76a   : > { %s3804_s25 = smov %s3794_s15 }
 0x76d   :  { %2216 = vsyncpa [#allocation4], 1 }
 0x76e   :  { %2218 = vsyncpa [#allocation4 + $0x1], 1 }
 0x76f   :  { %2219 = vsyncpa [#allocation7], 1 }
 0x770   :  { %2221 = vsyncpa [#allocation7 + $0x1], 1 }
 0x771   :  { %2222 = vsyncpa [#allocation10], 1 }
 0x772   :  { %2224 = vsyncpa [#allocation10 + $0x1], 1 }
 0x773   :  { %2225 = vsyncpa [#allocation5], 1 }
 0x774   :  { %2227 = vsyncpa [#allocation5 + $0x1], 1 }

</bundles_post_ra>
